<compile_context>
chip_gen: v6e
topology: v6e:2x2x1
jax: 0.10.0
libtpu: 0.0.40
codegen_flags: <defaults>
</compile_context>

<pallas_src>
import numpy as np
import jax
import jax.numpy as jnp
from jax.experimental import pallas as pl
from jax.experimental.pallas import tpu as pltpu

EMBED = 512
NUM_HEADS = 4
HEAD_DIM = EMBED // NUM_HEADS  # 128


def _attn_weights_kernel(q_ref, k_ref, wq_ref, bq_ref, wk_ref, bk_ref, out_ref):
    # q_ref : (B_blk, Lq, 512) bf16     k_ref : (B_blk, Lk, 512) bf16
    # wq_ref/wk_ref : (512, 512) bf16 pre-transposed weights (x @ W^T == x @ w_ref)
    # bq_ref/bk_ref : (1, 512) f32
    # out_ref : (B_blk, Lq, Lk) f32  head-averaged softmax(QK^T/sqrt(d)) weights
    b_blk, Lq, D = q_ref.shape
    _, Lk, _ = k_ref.shape

    # Collapse the folded batch dim so each projection is ONE big MXU matmul
    # (layout-free: Lq / Lk are multiples of the 8-row sublane tile).
    q2 = q_ref[...].reshape(b_blk * Lq, D)
    k2 = k_ref[...].reshape(b_blk * Lk, D)

    Q = jnp.dot(q2, wq_ref[...], preferred_element_type=jnp.float32) + bq_ref[...]
    K = jnp.dot(k2, wk_ref[...], preferred_element_type=jnp.float32) + bk_ref[...]

    Qb = Q.astype(jnp.bfloat16)
    Kb = K.astype(jnp.bfloat16)

    scale = jnp.float32(1.0 / float(HEAD_DIM) ** 0.5)
    acc = jnp.zeros((b_blk, Lq, Lk), jnp.float32)

    # Static loop over 4 heads; each head slice is lane-aligned (128 wide).
    for h in range(NUM_HEADS):
        lo = h * HEAD_DIM
        hi = lo + HEAD_DIM
        qh = Qb[:, lo:hi].reshape(b_blk, Lq, HEAD_DIM)   # (B_blk, Lq, 128) bf16
        kh = Kb[:, lo:hi].reshape(b_blk, Lk, HEAD_DIM)   # (B_blk, Lk, 128) bf16
        # Contract on the shared last dim -- never materialize kh.T.
        s = jnp.einsum('bqd,bkd->bqk', qh, kh,
                       preferred_element_type=jnp.float32) * scale
        s = s - jnp.max(s, axis=-1, keepdims=True)
        p = jnp.exp(s)
        p = p * pl.reciprocal(jnp.sum(p, axis=-1, keepdims=True), approx=True)
        acc = acc + p

    # TODO(synk): for large Lk in production, block Lk to multiples of 128 (or
    # fuse a streaming top-k) so the output store is lane-dense.
    out_ref[...] = acc * jnp.float32(1.0 / NUM_HEADS)


def _pick_b_blk(B, Lq, target_m=256):
    """Largest divisor of B with b_blk*Lq <= target_m (fill the MXU M dim)."""
    b_blk = 1
    for d in range(1, B + 1):
        if B % d == 0 and d * Lq <= target_m:
            b_blk = d
    return b_blk


def attn_avg_weights(qst, fused, wq_t, bq, wk_t, bk, b_blk=None):
    B, Lq, D = qst.shape
    _, Lk, _ = fused.shape
    assert D == EMBED
    if b_blk is None:
        b_blk = _pick_b_blk(B, Lq)
    assert B % b_blk == 0
    grid = (B // b_blk,)

    # bf16 matmul inputs (halves DMA bytes, 2-3x MXU throughput); biases and
    # softmax stay in f32.
    qst_bf = qst.astype(jnp.bfloat16)
    fused_bf = fused.astype(jnp.bfloat16)
    wq_bf = wq_t.astype(jnp.bfloat16)
    wk_bf = wk_t.astype(jnp.bfloat16)
    bq32 = bq.astype(jnp.float32)
    bk32 = bk.astype(jnp.float32)

    return pl.pallas_call(
        _attn_weights_kernel,
        out_shape=jax.ShapeDtypeStruct((B, Lq, Lk), jnp.float32),
        grid_spec=pltpu.PrefetchScalarGridSpec(
            num_scalar_prefetch=0,
            grid=grid,
            in_specs=[
                pl.BlockSpec((b_blk, Lq, D), lambda b: (b, 0, 0)),
                pl.BlockSpec((b_blk, Lk, D), lambda b: (b, 0, 0)),
                pl.BlockSpec((D, D), lambda b: (0, 0)),
                pl.BlockSpec((1, D), lambda b: (0, 0)),
                pl.BlockSpec((D, D), lambda b: (0, 0)),
                pl.BlockSpec((1, D), lambda b: (0, 0)),
            ],
            out_specs=pl.BlockSpec((b_blk, Lq, Lk), lambda b: (b, 0, 0)),
        ),
        compiler_params=pltpu.CompilerParams(
            dimension_semantics=("parallel",)),
    )(qst_bf, fused_bf, wq_bf, bq32, wk_bf, bk32)


def temporal_perception(qst_input, fused_va_feat, wq_t, bq, wk_t, bk, top_k):
    """Full forward: averaged attention weights (Pallas) + top-k index glue."""
    temp_weights = attn_avg_weights(qst_input, fused_va_feat, wq_t, bq, wk_t, bk)
    # Same result as the PyTorch argsort / take-last-top_k / sort steps:
    # indices of the top_k largest weights, sorted by index value.
    _, top_idx = jax.lax.top_k(temp_weights, top_k)       # (B, Lq, top_k)
    return jnp.sort(top_idx, axis=-1)                     # int32


if __name__ == "__main__":
    B, Lq, Lk, TOP_K = 2, 8, 16, 3

    key = jax.random.PRNGKey(0)
    k_q, k_kv, k_w = jax.random.split(key, 3)

    qst_input = jax.random.normal(k_q, (B, Lq, EMBED), jnp.float32)
    fused_va_feat = jax.random.normal(k_kv, (B, Lk, EMBED), jnp.float32)

    # nn.MultiheadAttention parameters: in_proj_weight (3*E, E) xavier-uniform,
    # in_proj_bias zeros.  Only the Q and K slices affect the returned weights.
    bound = (6.0 / (EMBED + EMBED)) ** 0.5
    in_proj_weight = jax.random.uniform(
        k_w, (3 * EMBED, EMBED), jnp.float32, minval=-bound, maxval=bound)
    in_proj_bias = jnp.zeros((3 * EMBED,), jnp.float32)

    wq_t = in_proj_weight[:EMBED, :].T                    # (512, 512)
    wk_t = in_proj_weight[EMBED:2 * EMBED, :].T           # (512, 512)
    bq = in_proj_bias[:EMBED].reshape(1, EMBED)
    bk = in_proj_bias[EMBED:2 * EMBED].reshape(1, EMBED)

    out = temporal_perception(qst_input, fused_va_feat, wq_t, bq, wk_t, bk, TOP_K)
    out = jax.block_until_ready(out)
    out_np = np.asarray(out)   # mirrors .cpu().numpy() in the PyTorch module
    assert out_np.shape == (B, Lq, TOP_K)
    print("KERNEL_OK")
</pallas_src>

<mosaic_0001>
module attributes {stable_mosaic.version = 11 : i64} {
  func.func @_attn_weights_kernel(%arg0: i32, %arg1: memref<2x8x512xbf16, #tpu.memory_space<vmem>>, %arg2: memref<2x16x512xbf16, #tpu.memory_space<vmem>>, %arg3: memref<512x512xbf16, #tpu.memory_space<vmem>>, %arg4: memref<1x512xf32, #tpu.memory_space<vmem>>, %arg5: memref<512x512xbf16, #tpu.memory_space<vmem>>, %arg6: memref<1x512xf32, #tpu.memory_space<vmem>>, %arg7: memref<2x8x16xf32, #tpu.memory_space<vmem>>) attributes {dimension_semantics = [#tpu.dimension_semantics<parallel>], iteration_bounds = array<i64: 1>, scalar_prefetch = 0 : i64, scratch_operands = 0 : i64, tpu.core_type = #tpu.core_type<tc>, window_params = [{transform_indices = @transform_0, window_bounds = array<i64: 2, 8, 512>}, {transform_indices = @transform_1, window_bounds = array<i64: 2, 16, 512>}, {pipeline_mode = #tpu.pipeline_mode<synchronous>, transform_indices = @transform_2, window_bounds = array<i64: 512, 512>}, {pipeline_mode = #tpu.pipeline_mode<synchronous>, transform_indices = @transform_3, window_bounds = array<i64: 1, 512>}, {pipeline_mode = #tpu.pipeline_mode<synchronous>, transform_indices = @transform_4, window_bounds = array<i64: 512, 512>}, {pipeline_mode = #tpu.pipeline_mode<synchronous>, transform_indices = @transform_5, window_bounds = array<i64: 1, 512>}, {transform_indices = @transform_6, window_bounds = array<i64: 2, 8, 16>}]} {
    %c0 = arith.constant 0 : index
    %c0_0 = arith.constant 0 : index
    %c0_1 = arith.constant 0 : index
    %0 = vector.load %arg1[%c0, %c0_0, %c0_1] : memref<2x8x512xbf16, #tpu.memory_space<vmem>>, vector<2x8x512xbf16>
    %1 = vector.shape_cast %0 : vector<2x8x512xbf16> to vector<16x512xbf16>
    %c0_2 = arith.constant 0 : index
    %c0_3 = arith.constant 0 : index
    %c0_4 = arith.constant 0 : index
    %2 = vector.load %arg2[%c0_2, %c0_3, %c0_4] : memref<2x16x512xbf16, #tpu.memory_space<vmem>>, vector<2x16x512xbf16>
    %3 = vector.shape_cast %2 : vector<2x16x512xbf16> to vector<32x512xbf16>
    %c0_5 = arith.constant 0 : index
    %c0_6 = arith.constant 0 : index
    %4 = vector.load %arg3[%c0_5, %c0_6] : memref<512x512xbf16, #tpu.memory_space<vmem>>, vector<512x512xbf16>
    %cst = arith.constant dense<0.000000e+00> : vector<16x512xf32>
    %5 = tpu.matmul %1, %4, %cst {dimension_numbers = #tpu.dot_dimension_numbers<[1], [0], [0], [1], [0, 0, 1, 1], [], []>} : vector<16x512xbf16>, vector<512x512xbf16>, vector<16x512xf32> -> vector<16x512xf32>
    %c0_7 = arith.constant 0 : index
    %c0_8 = arith.constant 0 : index
    %6 = vector.load %arg4[%c0_7, %c0_8] : memref<1x512xf32, #tpu.memory_space<vmem>>, vector<1x512xf32>
    %7 = vector.broadcast %6 : vector<1x512xf32> to vector<16x512xf32>
    %8 = arith.addf %5, %7 : vector<16x512xf32>
    %c0_9 = arith.constant 0 : index
    %c0_10 = arith.constant 0 : index
    %9 = vector.load %arg5[%c0_9, %c0_10] : memref<512x512xbf16, #tpu.memory_space<vmem>>, vector<512x512xbf16>
    %cst_11 = arith.constant dense<0.000000e+00> : vector<32x512xf32>
    %10 = tpu.matmul %3, %9, %cst_11 {dimension_numbers = #tpu.dot_dimension_numbers<[1], [0], [0], [1], [0, 0, 1, 1], [], []>} : vector<32x512xbf16>, vector<512x512xbf16>, vector<32x512xf32> -> vector<32x512xf32>
    %c0_12 = arith.constant 0 : index
    %c0_13 = arith.constant 0 : index
    %11 = vector.load %arg6[%c0_12, %c0_13] : memref<1x512xf32, #tpu.memory_space<vmem>>, vector<1x512xf32>
    %12 = vector.broadcast %11 : vector<1x512xf32> to vector<32x512xf32>
    %13 = arith.addf %10, %12 : vector<32x512xf32>
    %14 = arith.truncf %8 : vector<16x512xf32> to vector<16x512xbf16>
    %15 = arith.truncf %13 : vector<32x512xf32> to vector<32x512xbf16>
    %cst_14 = arith.constant 0.000000e+00 : f32
    %16 = vector.broadcast %cst_14 : f32 to vector<2x8x16xf32>
    %17 = vector.extract_strided_slice %14 {offsets = [0, 0], sizes = [16, 128], strides = [1, 1]} : vector<16x512xbf16> to vector<16x128xbf16>
    %18 = vector.shape_cast %17 : vector<16x128xbf16> to vector<2x8x128xbf16>
    %19 = vector.extract_strided_slice %15 {offsets = [0, 0], sizes = [32, 128], strides = [1, 1]} : vector<32x512xbf16> to vector<32x128xbf16>
    %20 = vector.shape_cast %19 : vector<32x128xbf16> to vector<2x16x128xbf16>
    "tpu.trace_start"() <{level = 10 : i32, message = "bqd,bkd->bqk"}> : () -> ()
    %cst_15 = arith.constant dense<0.000000e+00> : vector<2x8x16xf32>
    %21 = tpu.matmul %18, %20, %cst_15 {dimension_numbers = #tpu.dot_dimension_numbers<[2], [2], [1], [1], [0, 0, 0, 1, 1, 1], [0], [0]>} : vector<2x8x128xbf16>, vector<2x16x128xbf16>, vector<2x8x16xf32> -> vector<2x8x16xf32>
    "tpu.trace_stop"() : () -> ()
    %cst_16 = arith.constant 0.0883883461 : f32
    %22 = vector.broadcast %cst_16 : f32 to vector<2x8x16xf32>
    %23 = arith.mulf %21, %22 : vector<2x8x16xf32>
    %cst_17 = arith.constant dense<0xFF800000> : vector<2x8xf32>
    %24 = vector.multi_reduction <maximumf>, %23, %cst_17 [2] : vector<2x8x16xf32> to vector<2x8xf32>
    %25 = vector.shape_cast %24 : vector<2x8xf32> to vector<2x8x1xf32>
    %26 = vector.broadcast %25 : vector<2x8x1xf32> to vector<2x8x16xf32>
    %27 = arith.subf %23, %26 : vector<2x8x16xf32>
    %28 = math.exp %27 : vector<2x8x16xf32>
    %cst_18 = arith.constant dense<0.000000e+00> : vector<2x8xf32>
    %29 = vector.multi_reduction <add>, %28, %cst_18 [2] : vector<2x8x16xf32> to vector<2x8xf32>
    %30 = vector.shape_cast %29 : vector<2x8xf32> to vector<2x8x1xf32>
    %31 = tpu.reciprocal %30 {approx = true} : vector<2x8x1xf32> -> vector<2x8x1xf32>
    %32 = vector.broadcast %31 : vector<2x8x1xf32> to vector<2x8x16xf32>
    %33 = arith.mulf %28, %32 : vector<2x8x16xf32>
    %34 = arith.addf %16, %33 : vector<2x8x16xf32>
    %35 = vector.extract_strided_slice %14 {offsets = [0, 128], sizes = [16, 128], strides = [1, 1]} : vector<16x512xbf16> to vector<16x128xbf16>
    %36 = vector.shape_cast %35 : vector<16x128xbf16> to vector<2x8x128xbf16>
    %37 = vector.extract_strided_slice %15 {offsets = [0, 128], sizes = [32, 128], strides = [1, 1]} : vector<32x512xbf16> to vector<32x128xbf16>
    %38 = vector.shape_cast %37 : vector<32x128xbf16> to vector<2x16x128xbf16>
    "tpu.trace_start"() <{level = 10 : i32, message = "bqd,bkd->bqk"}> : () -> ()
    %cst_19 = arith.constant dense<0.000000e+00> : vector<2x8x16xf32>
    %39 = tpu.matmul %36, %38, %cst_19 {dimension_numbers = #tpu.dot_dimension_numbers<[2], [2], [1], [1], [0, 0, 0, 1, 1, 1], [0], [0]>} : vector<2x8x128xbf16>, vector<2x16x128xbf16>, vector<2x8x16xf32> -> vector<2x8x16xf32>
    "tpu.trace_stop"() : () -> ()
    %cst_20 = arith.constant 0.0883883461 : f32
    %40 = vector.broadcast %cst_20 : f32 to vector<2x8x16xf32>
    %41 = arith.mulf %39, %40 : vector<2x8x16xf32>
    %cst_21 = arith.constant dense<0xFF800000> : vector<2x8xf32>
    %42 = vector.multi_reduction <maximumf>, %41, %cst_21 [2] : vector<2x8x16xf32> to vector<2x8xf32>
    %43 = vector.shape_cast %42 : vector<2x8xf32> to vector<2x8x1xf32>
    %44 = vector.broadcast %43 : vector<2x8x1xf32> to vector<2x8x16xf32>
    %45 = arith.subf %41, %44 : vector<2x8x16xf32>
    %46 = math.exp %45 : vector<2x8x16xf32>
    %cst_22 = arith.constant dense<0.000000e+00> : vector<2x8xf32>
    %47 = vector.multi_reduction <add>, %46, %cst_22 [2] : vector<2x8x16xf32> to vector<2x8xf32>
    %48 = vector.shape_cast %47 : vector<2x8xf32> to vector<2x8x1xf32>
    %49 = tpu.reciprocal %48 {approx = true} : vector<2x8x1xf32> -> vector<2x8x1xf32>
    %50 = vector.broadcast %49 : vector<2x8x1xf32> to vector<2x8x16xf32>
    %51 = arith.mulf %46, %50 : vector<2x8x16xf32>
    %52 = arith.addf %34, %51 : vector<2x8x16xf32>
    %53 = vector.extract_strided_slice %14 {offsets = [0, 256], sizes = [16, 128], strides = [1, 1]} : vector<16x512xbf16> to vector<16x128xbf16>
    %54 = vector.shape_cast %53 : vector<16x128xbf16> to vector<2x8x128xbf16>
    %55 = vector.extract_strided_slice %15 {offsets = [0, 256], sizes = [32, 128], strides = [1, 1]} : vector<32x512xbf16> to vector<32x128xbf16>
    %56 = vector.shape_cast %55 : vector<32x128xbf16> to vector<2x16x128xbf16>
    "tpu.trace_start"() <{level = 10 : i32, message = "bqd,bkd->bqk"}> : () -> ()
    %cst_23 = arith.constant dense<0.000000e+00> : vector<2x8x16xf32>
    %57 = tpu.matmul %54, %56, %cst_23 {dimension_numbers = #tpu.dot_dimension_numbers<[2], [2], [1], [1], [0, 0, 0, 1, 1, 1], [0], [0]>} : vector<2x8x128xbf16>, vector<2x16x128xbf16>, vector<2x8x16xf32> -> vector<2x8x16xf32>
    "tpu.trace_stop"() : () -> ()
    %cst_24 = arith.constant 0.0883883461 : f32
    %58 = vector.broadcast %cst_24 : f32 to vector<2x8x16xf32>
    %59 = arith.mulf %57, %58 : vector<2x8x16xf32>
    %cst_25 = arith.constant dense<0xFF800000> : vector<2x8xf32>
    %60 = vector.multi_reduction <maximumf>, %59, %cst_25 [2] : vector<2x8x16xf32> to vector<2x8xf32>
    %61 = vector.shape_cast %60 : vector<2x8xf32> to vector<2x8x1xf32>
    %62 = vector.broadcast %61 : vector<2x8x1xf32> to vector<2x8x16xf32>
    %63 = arith.subf %59, %62 : vector<2x8x16xf32>
    %64 = math.exp %63 : vector<2x8x16xf32>
    %cst_26 = arith.constant dense<0.000000e+00> : vector<2x8xf32>
    %65 = vector.multi_reduction <add>, %64, %cst_26 [2] : vector<2x8x16xf32> to vector<2x8xf32>
    %66 = vector.shape_cast %65 : vector<2x8xf32> to vector<2x8x1xf32>
    %67 = tpu.reciprocal %66 {approx = true} : vector<2x8x1xf32> -> vector<2x8x1xf32>
    %68 = vector.broadcast %67 : vector<2x8x1xf32> to vector<2x8x16xf32>
    %69 = arith.mulf %64, %68 : vector<2x8x16xf32>
    %70 = arith.addf %52, %69 : vector<2x8x16xf32>
    %71 = vector.extract_strided_slice %14 {offsets = [0, 384], sizes = [16, 128], strides = [1, 1]} : vector<16x512xbf16> to vector<16x128xbf16>
    %72 = vector.shape_cast %71 : vector<16x128xbf16> to vector<2x8x128xbf16>
    %73 = vector.extract_strided_slice %15 {offsets = [0, 384], sizes = [32, 128], strides = [1, 1]} : vector<32x512xbf16> to vector<32x128xbf16>
    %74 = vector.shape_cast %73 : vector<32x128xbf16> to vector<2x16x128xbf16>
    "tpu.trace_start"() <{level = 10 : i32, message = "bqd,bkd->bqk"}> : () -> ()
    %cst_27 = arith.constant dense<0.000000e+00> : vector<2x8x16xf32>
    %75 = tpu.matmul %72, %74, %cst_27 {dimension_numbers = #tpu.dot_dimension_numbers<[2], [2], [1], [1], [0, 0, 0, 1, 1, 1], [0], [0]>} : vector<2x8x128xbf16>, vector<2x16x128xbf16>, vector<2x8x16xf32> -> vector<2x8x16xf32>
    "tpu.trace_stop"() : () -> ()
    %cst_28 = arith.constant 0.0883883461 : f32
    %76 = vector.broadcast %cst_28 : f32 to vector<2x8x16xf32>
    %77 = arith.mulf %75, %76 : vector<2x8x16xf32>
    %cst_29 = arith.constant dense<0xFF800000> : vector<2x8xf32>
    %78 = vector.multi_reduction <maximumf>, %77, %cst_29 [2] : vector<2x8x16xf32> to vector<2x8xf32>
    %79 = vector.shape_cast %78 : vector<2x8xf32> to vector<2x8x1xf32>
    %80 = vector.broadcast %79 : vector<2x8x1xf32> to vector<2x8x16xf32>
    %81 = arith.subf %77, %80 : vector<2x8x16xf32>
    %82 = math.exp %81 : vector<2x8x16xf32>
    %cst_30 = arith.constant dense<0.000000e+00> : vector<2x8xf32>
    %83 = vector.multi_reduction <add>, %82, %cst_30 [2] : vector<2x8x16xf32> to vector<2x8xf32>
    %84 = vector.shape_cast %83 : vector<2x8xf32> to vector<2x8x1xf32>
    %85 = tpu.reciprocal %84 {approx = true} : vector<2x8x1xf32> -> vector<2x8x1xf32>
    %86 = vector.broadcast %85 : vector<2x8x1xf32> to vector<2x8x16xf32>
    %87 = arith.mulf %82, %86 : vector<2x8x16xf32>
    %88 = arith.addf %70, %87 : vector<2x8x16xf32>
    %cst_31 = arith.constant 2.500000e-01 : f32
    %89 = vector.broadcast %cst_31 : f32 to vector<2x8x16xf32>
    %90 = arith.mulf %88, %89 : vector<2x8x16xf32>
    %c0_32 = arith.constant 0 : index
    %c0_33 = arith.constant 0 : index
    %c0_34 = arith.constant 0 : index
    %91 = vector.load %arg7[%c0_32, %c0_33, %c0_34] : memref<2x8x16xf32, #tpu.memory_space<vmem>>, vector<2x8x16xf32>
    tpu.vector_store %arg7[%c0_32, %c0_33, %c0_34], %90 {strides = array<i32>} : memref<2x8x16xf32, #tpu.memory_space<vmem>>, vector<2x8x16xf32>,
    return
  }
  func.func @transform_0(%arg0: i32) -> (i32, i32, i32) {
    %c0_i32 = arith.constant 0 : i32
    %c0_i32_0 = arith.constant 0 : i32
    %c0_i32_1 = arith.constant 0 : i32
    return %arg0, %c0_i32, %c0_i32_0 : i32, i32, i32
  }
  func.func @transform_1(%arg0: i32) -> (i32, i32, i32) {
    %c0_i32 = arith.constant 0 : i32
    %c0_i32_0 = arith.constant 0 : i32
    %c0_i32_1 = arith.constant 0 : i32
    return %arg0, %c0_i32, %c0_i32_0 : i32, i32, i32
  }
  func.func @transform_2(%arg0: i32) -> (i32, i32) {
    %c0_i32 = arith.constant 0 : i32
    %c0_i32_0 = arith.constant 0 : i32
    %c0_i32_1 = arith.constant 0 : i32
    return %c0_i32, %c0_i32_0 : i32, i32
  }
  func.func @transform_3(%arg0: i32) -> (i32, i32) {
    %c0_i32 = arith.constant 0 : i32
    %c0_i32_0 = arith.constant 0 : i32
    %c0_i32_1 = arith.constant 0 : i32
    return %c0_i32, %c0_i32_0 : i32, i32
  }
  func.func @transform_4(%arg0: i32) -> (i32, i32) {
    %c0_i32 = arith.constant 0 : i32
    %c0_i32_0 = arith.constant 0 : i32
    %c0_i32_1 = arith.constant 0 : i32
    return %c0_i32, %c0_i32_0 : i32, i32
  }
  func.func @transform_5(%arg0: i32) -> (i32, i32) {
    %c0_i32 = arith.constant 0 : i32
    %c0_i32_0 = arith.constant 0 : i32
    %c0_i32_1 = arith.constant 0 : i32
    return %c0_i32, %c0_i32_0 : i32, i32
  }
  func.func @transform_6(%arg0: i32) -> (i32, i32, i32) {
    %c0_i32 = arith.constant 0 : i32
    %c0_i32_0 = arith.constant 0 : i32
    %c0_i32_1 = arith.constant 0 : i32
    return %arg0, %c0_i32, %c0_i32_0 : i32, i32, i32
  }
}

</mosaic_0001>

<bundles_post_ra>
// kernel: tpu_custom_call.1
= control target key start
LH: loop header
LB: loop body
LE: loop exit
PB: predicated region body
PF: predicated region fallthrough
CT: control target
= control target key end

     0   :  { %11 = vsyncpa [#allocation3], 0  ;;  %s3724_s0 = inlined_call_operand.hbm [shape: bf16[2,8,512], index: 0, kind: input, shape index: {}]   ;;  %s3725_s1 = inlined_call_operand.hbm [shape: bf16[2,16,512], index: 1, kind: input, shape index: {}]   ;;  %s3726_s2 = inlined_call_operand.hbm [shape: bf16[512,512], index: 2, kind: input, shape index: {}]   ;;  %s3727_s3 = inlined_call_operand.vmem [shape: f32[1,512], index: 3, kind: input, shape index: {}]   ;;  %s3728_s4 = inlined_call_operand.hbm [shape: bf16[512,512], index: 4, kind: input, shape index: {}]   ;;  %s3729_s5 = inlined_call_operand.vmem [shape: f32[1,512], index: 5, kind: input, shape index: {}]   ;;  %s3730_s6 = inlined_call_operand.hbm [shape: f32[2,8,16], index: 6, kind: output, shape index: {}]  }
   0x1   :  { %12 = vsyncpa [#allocation6], 0 }
   0x2   :  { %13 = vsyncpa [#allocation9], 0 }
   0x3   :  { %14 = vsyncpa [#allocation4], 0  ;;  %s3505_s21 = smov [#allocation5]   ;;  %s3506_s23 = smov [#allocation2]  }
   0x4   :  { %s32_s22 = sshll.u32 %s3505_s21, 4  ;;  %s20_s24 = sshll.u32 %s3506_s23, 4  ;;  %s33_s22 = int_to_ptr.vmem [resolvable:$true] %s32_s22  ;;  %s21_s24 = int_to_ptr.vmem [resolvable:$true] %s20_s24 }
   0x5   :  { %s3405_s25 = scalar_lea.vmem %s33_s22, 1024  ;;  %p3410_p1 = scmp.lt.s32.totalorder %s33_s22, %s33_s22 }
   0x6   :  { %p3406_p0 = scmp.ne.s32.totalorder %s33_s22, %s3405_s25  ;;  %p3411_p2 = scmp.lt.s32.totalorder %s3405_s25, %s3405_s25 }
   0x8   :  { %p3412_p3 = por %p3411_p2, %p3410_p1 }
   0xa   :  { %p3413_p4 = pnand %p3412_p3, %p3406_p0 }
   0xc   :  { %3416 = shalt.err (!%p3413_p4)
}
   0xd   :  { %s3507_s26 = smov 256   ;;  %s3508_s27 = smov 16  }
   0xe   :  { %38 = dma.hbm_to_vmem [thread:$0]  %s3725_s1, 1024, %s33_s22, [#allocation6], %s3507_s26, %s3507_s26, %s3508_s27  }
   0xf   :  { %s3425_s30 = scalar_lea.vmem %s21_s24, 512  ;;  %p3430_p6 = scmp.lt.s32.totalorder %s21_s24, %s21_s24 }
  0x10   :  { %p3426_p5 = scmp.ne.s32.totalorder %s21_s24, %s3425_s30  ;;  %p3431_p7 = scmp.lt.s32.totalorder %s3425_s30, %s3425_s30 }
  0x12   :  { %p3432_p8 = por %p3431_p7, %p3430_p6 }
  0x14   :  { %p3433_p9 = pnand %p3432_p8, %p3426_p5 }
  0x16   :  { %3436 = shalt.err (!%p3433_p9)
}
  0x17   :  { %26 = dma.hbm_to_vmem [thread:$0]  %s3724_s0, 512, %s21_s24, [#allocation3], %s3507_s26, %s3507_s26, %s3508_s27  }
  0x18   :  { %s3509_s9 = smov [#allocation7]   ;;  %s3510_s11 = smov [#allocation8]  }
  0x19   :  { %s44_s10 = sshll.u32 %s3509_s9, 4  ;;  %s58_s12 = sshll.u32 %s3510_s11, 4  ;;  %s45_s10 = int_to_ptr.vmem [resolvable:$true] %s44_s10  ;;  %s59_s12 = int_to_ptr.vmem [resolvable:$true] %s58_s12 }
  0x1a   :  { %s3445_s1 = scalar_lea.vmem %s45_s10, 16384  ;;  %p3450_p11 = scmp.lt.s32.totalorder %s45_s10, %s45_s10 }
  0x1b   :  { %p3446_p10 = scmp.ne.s32.totalorder %s45_s10, %s3445_s1  ;;  %p3451_p12 = scmp.lt.s32.totalorder %s3445_s1, %s3445_s1 }
  0x1d   :  { %p3452_p13 = por %p3451_p12, %p3450_p11 }
  0x1f   :  { %p3453_p0 = pnand %p3452_p13, %p3446_p10 }
  0x21   :  { %3456 = shalt.err (!%p3453_p0)
}
  0x22   :  { %50 = dma.hbm_to_vmem [thread:$0]  %s3726_s2, 16384, %s45_s10, [#allocation6], %s3507_s26, %s3507_s26, %s3508_s27  }
  0x23   :  { %s3465_s0 = scalar_lea.vmem %s59_s12, 16384  ;;  %p3470_p2 = scmp.lt.s32.totalorder %s59_s12, %s59_s12 }
  0x24   :  { %p3466_p1 = scmp.ne.s32.totalorder %s59_s12, %s3465_s0  ;;  %p3471_p3 = scmp.lt.s32.totalorder %s3465_s0, %s3465_s0 }
  0x26   :  { %p3472_p4 = por %p3471_p3, %p3470_p2 }
  0x28   :  { %p3473_p5 = pnand %p3472_p4, %p3466_p1 }
  0x2a   :  { %3476 = shalt.err (!%p3473_p5)
}
  0x2b   :  { %64 = dma.hbm_to_vmem [thread:$0]  %s3728_s4, 16384, %s59_s12, [#allocation9], %s3507_s26, %s3507_s26, %s3508_s27  }
  0x2c   :  { %3497 = dma.done.wait [#allocation3], 512  }
  0x2d   :  { %3498 = vsyncadd [#allocation3], 4294966784 }
  0x2e   :  { %3499 = dma.done.wait [#allocation6], 17408  }
  0x2f   :  { %3500 = vsyncadd [#allocation6], 4294949888 }
  0x30   :  { %3501 = dma.done.wait [#allocation9], 16384  }
  0x31   :  { %3502 = vsyncadd [#allocation9], 4294950912  ;;  %v2963_v0 = vld [vmem:[#allocation7 + $0xe4] ss:$16 sps:$4 sm:$0xff]   ;;  %v2967_v2 = vld [vmem:[#allocation7 + $0xe0] ss:$16 sps:$4 sm:$0xff]  }
  0x32   :  { %v2965_v1 = vld [vmem:[#allocation7 + $0x2e4] ss:$16 sps:$4 sm:$0xff]   ;;  %902 = vmatprep.subr.bf16.mxu0 %v2963_v0  ;;  %v2968_v3 = vld [vmem:[#allocation7 + $0x2e0] ss:$16 sps:$4 sm:$0xff]   ;;  %v3064_v51 = vld [vmem:[#allocation2 + $0xc] ss:$16 sps:$4 sm:$0xff]  }
  0x33   :  { %945 = vmatprep.subr.bf16.mxu1 %v2965_v1  ;;  %v2969_v4 = vld [vmem:[#allocation7 + $0xc4] ss:$16 sps:$4 sm:$0xff]   ;;  %903 = vmatpush1.bf16.msra.mxu0 %v2967_v2  ;;  %v2973_v6 = vld [vmem:[#allocation7 + $0xc0] ss:$16 sps:$4 sm:$0xff]   ;;  %v3067_v2 = vld [vmem:[#allocation7 + $0xec] ss:$16 sps:$4 sm:$0xff]  }
  0x34   :  { %946 = vmatpush1.bf16.msra.mxu1 %v2968_v3  ;;  %v2971_v5 = vld [vmem:[#allocation7 + $0x2c4] ss:$16 sps:$4 sm:$0xff]   ;;  %904 = vmatprep.subr.bf16.mxu0 %v2969_v4  ;;  %v2974_v7 = vld [vmem:[#allocation7 + $0x2c0] ss:$16 sps:$4 sm:$0xff]   ;;  %v3070_v3 = vld [vmem:[#allocation7 + $0x2ec] ss:$16 sps:$4 sm:$0xff]  }
  0x35   :  { %947 = vmatprep.subr.bf16.mxu1 %v2971_v5  ;;  %v2975_v8 = vld [vmem:[#allocation7 + $0xa4] ss:$16 sps:$4 sm:$0xff]   ;;  %v2979_v10 = vld [vmem:[#allocation7 + $0xa0] ss:$16 sps:$4 sm:$0xff]   ;;  %977 = vmatprep.mubr.bf16.mxu1 %v3064_v51  ;;  %v3577_v5 = vld [vmem:[#allocation2 + $0x8] ss:$16 sps:$4 sm:$0xff]  }
  0x36   :  { %v2977_v9 = vld [vmem:[#allocation7 + $0x2a4] ss:$16 sps:$4 sm:$0xff]   ;;  %v2980_v11 = vld [vmem:[#allocation7 + $0x2a0] ss:$16 sps:$4 sm:$0xff]   ;;  %vm3512_vm0 = vmmov 0   ;;  %vm2217_vm1 = vcmask 130048  }
  0x37   :  { %905 = vmatpush1.bf16.msra.mxu0 %v2973_v6  ;;  %v2981_v12 = vld [vmem:[#allocation7 + $0x84] ss:$16 sps:$4 sm:$0xff]   ;;  %v2985_v14 = vld [vmem:[#allocation7 + $0x80] ss:$16 sps:$4 sm:$0xff]   ;;  %v3065_v6 = vld [vmem:[#allocation7 + $0xe8] ss:$16 sps:$4 sm:$0xff]  }
  0x38   :  { %948 = vmatpush1.bf16.msra.mxu1 %v2974_v7  ;;  %906 = vmatprep.subr.bf16.mxu0 %v2975_v8  ;;  %v2983_v13 = vld [vmem:[#allocation7 + $0x284] ss:$16 sps:$4 sm:$0xff]   ;;  %v2986_v15 = vld [vmem:[#allocation7 + $0x280] ss:$16 sps:$4 sm:$0xff]   ;;  %v3068_v7 = vld [vmem:[#allocation7 + $0x2e8] ss:$16 sps:$4 sm:$0xff]  }
  0x39   :  { %949 = vmatprep.subr.bf16.mxu1 %v2977_v9  ;;  %v2987_v16 = vld [vmem:[#allocation7 + $0x64] ss:$16 sps:$4 sm:$0xff]   ;;  %v2991_v18 = vld [vmem:[#allocation7 + $0x60] ss:$16 sps:$4 sm:$0xff]   ;;  %v3073_v8 = vld [vmem:[#allocation7 + $0xcc] ss:$16 sps:$4 sm:$0xff]  }
  0x3a   :  { %v2989_v17 = vld [vmem:[#allocation7 + $0x264] ss:$16 sps:$4 sm:$0xff]   ;;  %v2992_v19 = vld [vmem:[#allocation7 + $0x260] ss:$16 sps:$4 sm:$0xff]   ;;  %v3076_v9 = vld [vmem:[#allocation7 + $0x2cc] ss:$16 sps:$4 sm:$0xff]  }
  0x3b   :  { %907 = vmatpush1.bf16.msra.mxu0 %v2979_v10  ;;  %v2993_v20 = vld [vmem:[#allocation7 + $0x44] ss:$16 sps:$4 sm:$0xff]   ;;  %v2997_v22 = vld [vmem:[#allocation7 + $0x40] ss:$16 sps:$4 sm:$0xff]   ;;  %v3071_v10 = vld [vmem:[#allocation7 + $0xc8] ss:$16 sps:$4 sm:$0xff]  }
  0x3c   :  { %950 = vmatpush1.bf16.msra.mxu1 %v2980_v11  ;;  %908 = vmatprep.subr.bf16.mxu0 %v2981_v12  ;;  %v2995_v21 = vld [vmem:[#allocation7 + $0x244] ss:$16 sps:$4 sm:$0xff]   ;;  %v2998_v23 = vld [vmem:[#allocation7 + $0x240] ss:$16 sps:$4 sm:$0xff]   ;;  %v3074_v11 = vld [vmem:[#allocation7 + $0x2c8] ss:$16 sps:$4 sm:$0xff]  }
  0x3d   :  { %951 = vmatprep.subr.bf16.mxu1 %v2983_v13  ;;  %v2999_v24 = vld [vmem:[#allocation7 + $0x24] ss:$16 sps:$4 sm:$0xff]   ;;  %v3003_v26 = vld [vmem:[#allocation7 + $0x20] ss:$16 sps:$4 sm:$0xff]   ;;  %v3079_v12 = vld [vmem:[#allocation7 + $0xac] ss:$16 sps:$4 sm:$0xff]  }
  0x3e   :  { %v3001_v25 = vld [vmem:[#allocation7 + $0x224] ss:$16 sps:$4 sm:$0xff]   ;;  %v3004_v27 = vld [vmem:[#allocation7 + $0x220] ss:$16 sps:$4 sm:$0xff]   ;;  %v3082_v13 = vld [vmem:[#allocation7 + $0x2ac] ss:$16 sps:$4 sm:$0xff]  }
  0x3f   :  { %909 = vmatpush1.bf16.msra.mxu0 %v2985_v14  ;;  %v3005_v28 = vld [vmem:[#allocation7 + $0x4] ss:$16 sps:$4 sm:$0xff]   ;;  %v3009_v30 = vld [vmem:[#allocation7] ss:$16 sps:$4 sm:$0xff]   ;;  %v3077_v14 = vld [vmem:[#allocation7 + $0xa8] ss:$16 sps:$4 sm:$0xff]  }
  0x40   :  { %952 = vmatpush1.bf16.msra.mxu1 %v2986_v15  ;;  %910 = vmatprep.subr.bf16.mxu0 %v2987_v16  ;;  %v3007_v29 = vld [vmem:[#allocation7 + $0x204] ss:$16 sps:$4 sm:$0xff]   ;;  %v3010_v31 = vld [vmem:[#allocation7 + $0x200] ss:$16 sps:$4 sm:$0xff]   ;;  %v3080_v15 = vld [vmem:[#allocation7 + $0x2a8] ss:$16 sps:$4 sm:$0xff]  }
  0x41   :  { %953 = vmatprep.subr.bf16.mxu1 %v2989_v17  ;;  %v3011_v32 = vld [vmem:[#allocation7 + $0x1e4] ss:$16 sps:$4 sm:$0xff]   ;;  %v3015_v34 = vld [vmem:[#allocation7 + $0x1e0] ss:$16 sps:$4 sm:$0xff]   ;;  %v3085_v16 = vld [vmem:[#allocation7 + $0x8c] ss:$16 sps:$4 sm:$0xff]  }
  0x42   :  { %v3013_v33 = vld [vmem:[#allocation7 + $0x3e4] ss:$16 sps:$4 sm:$0xff]   ;;  %v3016_v35 = vld [vmem:[#allocation7 + $0x3e0] ss:$16 sps:$4 sm:$0xff]   ;;  %v3088_v17 = vld [vmem:[#allocation7 + $0x28c] ss:$16 sps:$4 sm:$0xff]  }
  0x43   :  { %911 = vmatpush1.bf16.msra.mxu0 %v2991_v18  ;;  %v3017_v36 = vld [vmem:[#allocation7 + $0x1c4] ss:$16 sps:$4 sm:$0xff]   ;;  %v3021_v38 = vld [vmem:[#allocation7 + $0x1c0] ss:$16 sps:$4 sm:$0xff]   ;;  %v3083_v18 = vld [vmem:[#allocation7 + $0x88] ss:$16 sps:$4 sm:$0xff]  }
  0x44   :  { %954 = vmatpush1.bf16.msra.mxu1 %v2992_v19  ;;  %912 = vmatprep.subr.bf16.mxu0 %v2993_v20  ;;  %v3019_v37 = vld [vmem:[#allocation7 + $0x3c4] ss:$16 sps:$4 sm:$0xff]   ;;  %v3022_v39 = vld [vmem:[#allocation7 + $0x3c0] ss:$16 sps:$4 sm:$0xff]   ;;  %v3086_v19 = vld [vmem:[#allocation7 + $0x288] ss:$16 sps:$4 sm:$0xff]  }
  0x45   :  { %955 = vmatprep.subr.bf16.mxu1 %v2995_v21  ;;  %v3023_v40 = vld [vmem:[#allocation7 + $0x1a4] ss:$16 sps:$4 sm:$0xff]   ;;  %v3027_v42 = vld [vmem:[#allocation7 + $0x1a0] ss:$16 sps:$4 sm:$0xff]   ;;  %v3091_v20 = vld [vmem:[#allocation7 + $0x6c] ss:$16 sps:$4 sm:$0xff]  }
  0x46   :  { %v3025_v41 = vld [vmem:[#allocation7 + $0x3a4] ss:$16 sps:$4 sm:$0xff]   ;;  %v3028_v43 = vld [vmem:[#allocation7 + $0x3a0] ss:$16 sps:$4 sm:$0xff]   ;;  %v3094_v21 = vld [vmem:[#allocation7 + $0x26c] ss:$16 sps:$4 sm:$0xff]  }
  0x47   :  { %913 = vmatpush1.bf16.msra.mxu0 %v2997_v22  ;;  %v3029_v44 = vld [vmem:[#allocation7 + $0x184] ss:$16 sps:$4 sm:$0xff]   ;;  %v3033_v46 = vld [vmem:[#allocation7 + $0x180] ss:$16 sps:$4 sm:$0xff]   ;;  %v3089_v22 = vld [vmem:[#allocation7 + $0x68] ss:$16 sps:$4 sm:$0xff]  }
  0x48   :  { %956 = vmatpush1.bf16.msra.mxu1 %v2998_v23  ;;  %914 = vmatprep.subr.bf16.mxu0 %v2999_v24  ;;  %v3031_v45 = vld [vmem:[#allocation7 + $0x384] ss:$16 sps:$4 sm:$0xff]   ;;  %v3034_v47 = vld [vmem:[#allocation7 + $0x380] ss:$16 sps:$4 sm:$0xff]   ;;  %v3092_v23 = vld [vmem:[#allocation7 + $0x268] ss:$16 sps:$4 sm:$0xff]  }
  0x49   :  { %957 = vmatprep.subr.bf16.mxu1 %v3001_v25  ;;  %v3035_v48 = vld [vmem:[#allocation7 + $0x164] ss:$16 sps:$4 sm:$0xff]   ;;  %v3039_v52 = vld [vmem:[#allocation7 + $0x160] ss:$16 sps:$4 sm:$0xff]   ;;  %v3097_v24 = vld [vmem:[#allocation7 + $0x4c] ss:$16 sps:$4 sm:$0xff]  }
  0x4a   :  { %v3061_v49 = vld [vmem:[#allocation2 + $0x4] ss:$16 sps:$4 sm:$0xff]   ;;  %v3040_v53 = vld [vmem:[#allocation7 + $0x360] ss:$16 sps:$4 sm:$0xff]   ;;  %v3100_v25 = vld [vmem:[#allocation7 + $0x24c] ss:$16 sps:$4 sm:$0xff]  }
  0x4b   :  { %915 = vmatpush1.bf16.msra.mxu0 %v3003_v26  ;;  %v3037_v50 = vld [vmem:[#allocation7 + $0x364] ss:$16 sps:$4 sm:$0xff]   ;;  %934 = vmatprep.mubr.bf16.mxu0 %v3061_v49  ;;  %v3045_v56 = vld [vmem:[#allocation7 + $0x140] ss:$16 sps:$4 sm:$0xff]   ;;  %v3095_v26 = vld [vmem:[#allocation7 + $0x48] ss:$16 sps:$4 sm:$0xff]  }
  0x4c   :  { %958 = vmatpush1.bf16.msra.mxu1 %v3004_v27  ;;  %916 = vmatprep.subr.bf16.mxu0 %v3005_v28  ;;  %v3041_v54 = vld [vmem:[#allocation7 + $0x144] ss:$16 sps:$4 sm:$0xff]   ;;  %v3046_v57 = vld [vmem:[#allocation7 + $0x340] ss:$16 sps:$4 sm:$0xff]   ;;  %v3098_v27 = vld [vmem:[#allocation7 + $0x248] ss:$16 sps:$4 sm:$0xff]  }
  0x4d   :  { %959 = vmatprep.subr.bf16.mxu1 %v3007_v29  ;;  %v3043_v55 = vld [vmem:[#allocation7 + $0x344] ss:$16 sps:$4 sm:$0xff]   ;;  %v3051_v60 = vld [vmem:[#allocation7 + $0x120] ss:$16 sps:$4 sm:$0xff]   ;;  %v3103_v28 = vld [vmem:[#allocation7 + $0x2c] ss:$16 sps:$4 sm:$0xff]  }
  0x4e   :  { %v3047_v58 = vld [vmem:[#allocation7 + $0x124] ss:$16 sps:$4 sm:$0xff]   ;;  %v3052_v61 = vld [vmem:[#allocation7 + $0x320] ss:$16 sps:$4 sm:$0xff]   ;;  %v3106_v29 = vld [vmem:[#allocation7 + $0x22c] ss:$16 sps:$4 sm:$0xff]  }
  0x4f   :  { %917 = vmatpush1.bf16.msra.mxu0 %v3009_v30  ;;  %v3049_v59 = vld [vmem:[#allocation7 + $0x324] ss:$16 sps:$4 sm:$0xff]   ;;  %v3057_v0 = vld [vmem:[#allocation7 + $0x100] ss:$16 sps:$4 sm:$0xff]   ;;  %v3101_v30 = vld [vmem:[#allocation7 + $0x28] ss:$16 sps:$4 sm:$0xff]  }
  0x50   :  { %960 = vmatpush1.bf16.msra.mxu1 %v3010_v31  ;;  %918 = vmatprep.subr.bf16.mxu0 %v3011_v32  ;;  %v3053_v62 = vld [vmem:[#allocation7 + $0x104] ss:$16 sps:$4 sm:$0xff]   ;;  %v3058_v1 = vld [vmem:[#allocation7 + $0x300] ss:$16 sps:$4 sm:$0xff]   ;;  %v3104_v31 = vld [vmem:[#allocation7 + $0x228] ss:$16 sps:$4 sm:$0xff]  }
  0x51   :  { %961 = vmatprep.subr.bf16.mxu1 %v3013_v33  ;;  %v3055_v63 = vld [vmem:[#allocation7 + $0x304] ss:$16 sps:$4 sm:$0xff]   ;;  %v3575_v4 = vld [vmem:[#allocation2] ss:$16 sps:$4 sm:$0xff]   ;;  %v3109_v32 = vld [vmem:[#allocation7 + $0xc] ss:$16 sps:$4 sm:$0xff]  }
  0x52   :  { %v3112_v33 = vld [vmem:[#allocation7 + $0x20c] ss:$16 sps:$4 sm:$0xff]  }
  0x53   :  { %919 = vmatpush2.bf16.msra.mxu0 %v3015_v34  ;;  %v3107_v34 = vld [vmem:[#allocation7 + $0x8] ss:$16 sps:$4 sm:$0xff]  }
  0x54   :  { %962 = vmatpush2.bf16.msra.mxu1 %v3016_v35  ;;  %920 = vmatprep.subr.bf16.mxu0 %v3017_v36  ;;  %v3110_v35 = vld [vmem:[#allocation7 + $0x208] ss:$16 sps:$4 sm:$0xff]   ;;  %v3115_v36 = vld [vmem:[#allocation7 + $0x1ec] ss:$16 sps:$4 sm:$0xff]  }
  0x55   :  { %963 = vmatprep.subr.bf16.mxu1 %v3019_v37  ;;  %v3118_v37 = vld [vmem:[#allocation7 + $0x3ec] ss:$16 sps:$4 sm:$0xff]  }
  0x57   :  { %921 = vmatpush2.bf16.msra.mxu0 %v3021_v38  ;;  %v3113_v38 = vld [vmem:[#allocation7 + $0x1e8] ss:$16 sps:$4 sm:$0xff]  }
  0x58   :  { %964 = vmatpush2.bf16.msra.mxu1 %v3022_v39  ;;  %922 = vmatprep.subr.bf16.mxu0 %v3023_v40  ;;  %v3116_v39 = vld [vmem:[#allocation7 + $0x3e8] ss:$16 sps:$4 sm:$0xff]   ;;  %v3121_v40 = vld [vmem:[#allocation7 + $0x1cc] ss:$16 sps:$4 sm:$0xff]  }
  0x59   :  { %965 = vmatprep.subr.bf16.mxu1 %v3025_v41  ;;  %v3124_v41 = vld [vmem:[#allocation7 + $0x3cc] ss:$16 sps:$4 sm:$0xff]  }
  0x5b   :  { %923 = vmatpush2.bf16.msra.mxu0 %v3027_v42  ;;  %v3119_v42 = vld [vmem:[#allocation7 + $0x1c8] ss:$16 sps:$4 sm:$0xff]  }
  0x5c   :  { %966 = vmatpush2.bf16.msra.mxu1 %v3028_v43  ;;  %924 = vmatprep.subr.bf16.mxu0 %v3029_v44  ;;  %v3122_v43 = vld [vmem:[#allocation7 + $0x3c8] ss:$16 sps:$4 sm:$0xff]   ;;  %v3127_v44 = vld [vmem:[#allocation7 + $0x1ac] ss:$16 sps:$4 sm:$0xff]  }
  0x5d   :  { %967 = vmatprep.subr.bf16.mxu1 %v3031_v45  ;;  %v3130_v45 = vld [vmem:[#allocation7 + $0x3ac] ss:$16 sps:$4 sm:$0xff]  }
  0x5f   :  { %925 = vmatpush2.bf16.msra.mxu0 %v3033_v46  ;;  %v3125_v46 = vld [vmem:[#allocation7 + $0x1a8] ss:$16 sps:$4 sm:$0xff]  }
  0x60   :  { %968 = vmatpush2.bf16.msra.mxu1 %v3034_v47  ;;  %926 = vmatprep.subr.bf16.mxu0 %v3035_v48  ;;  %v3128_v47 = vld [vmem:[#allocation7 + $0x3a8] ss:$16 sps:$4 sm:$0xff]   ;;  %v3133_v48 = vld [vmem:[#allocation7 + $0x18c] ss:$16 sps:$4 sm:$0xff]  }
  0x61   :  { %969 = vmatprep.subr.bf16.mxu1 %v3037_v50  ;;  %v3131_v50 = vld [vmem:[#allocation7 + $0x188] ss:$16 sps:$4 sm:$0xff]  }
  0x63   :  { %927 = vmatpush2.bf16.msra.mxu0 %v3039_v52  ;;  %v3139_v52 = vld [vmem:[#allocation7 + $0x16c] ss:$16 sps:$4 sm:$0xff]  }
  0x64   :  { %970 = vmatpush2.bf16.msra.mxu1 %v3040_v53  ;;  %928 = vmatprep.subr.bf16.mxu0 %v3041_v54  ;;  %v3142_v53 = vld [vmem:[#allocation7 + $0x36c] ss:$16 sps:$4 sm:$0xff]   ;;  %v3137_v54 = vld [vmem:[#allocation7 + $0x168] ss:$16 sps:$4 sm:$0xff]  }
  0x65   :  { %971 = vmatprep.subr.bf16.mxu1 %v3043_v55  ;;  %v3140_v55 = vld [vmem:[#allocation7 + $0x368] ss:$16 sps:$4 sm:$0xff]  }
  0x67   :  { %929 = vmatpush2.bf16.msra.mxu0 %v3045_v56  ;;  %v3145_v56 = vld [vmem:[#allocation7 + $0x14c] ss:$16 sps:$4 sm:$0xff]  }
  0x68   :  { %972 = vmatpush2.bf16.msra.mxu1 %v3046_v57  ;;  %930 = vmatprep.subr.bf16.mxu0 %v3047_v58  ;;  %v3148_v57 = vld [vmem:[#allocation7 + $0x34c] ss:$16 sps:$4 sm:$0xff]   ;;  %v3143_v58 = vld [vmem:[#allocation7 + $0x148] ss:$16 sps:$4 sm:$0xff]  }
  0x69   :  { %973 = vmatprep.subr.bf16.mxu1 %v3049_v59  ;;  %v3146_v59 = vld [vmem:[#allocation7 + $0x348] ss:$16 sps:$4 sm:$0xff]  }
  0x6b   :  { %931 = vmatpush2.bf16.msra.mxu0 %v3051_v60  ;;  %v3151_v60 = vld [vmem:[#allocation7 + $0x12c] ss:$16 sps:$4 sm:$0xff]  }
  0x6c   :  { %974 = vmatpush2.bf16.msra.mxu1 %v3052_v61  ;;  %932 = vmatprep.subr.bf16.mxu0 %v3053_v62  ;;  %v3154_v61 = vld [vmem:[#allocation7 + $0x32c] ss:$16 sps:$4 sm:$0xff]   ;;  %v3149_v62 = vld [vmem:[#allocation7 + $0x128] ss:$16 sps:$4 sm:$0xff]  }
  0x6d   :  { %975 = vmatprep.subr.bf16.mxu1 %v3055_v63  ;;  %v3152_v63 = vld [vmem:[#allocation7 + $0x328] ss:$16 sps:$4 sm:$0xff]  }
  0x6f   :  { %933 = vmatpush2.bf16.msra.mxu0 %v3057_v0  ;;  %v3157_v0 = vld [vmem:[#allocation7 + $0x10c] ss:$16 sps:$4 sm:$0xff]  }
  0x70   :  { %976 = vmatpush2.bf16.msra.mxu1 %v3058_v1  ;;  %988 = vmatprep.subr.bf16.mxu0 %v3067_v2  ;;  %v3160_v1 = vld [vmem:[#allocation7 + $0x30c] ss:$16 sps:$4 sm:$0xff]   ;;  %v3155_v2 = vld [vmem:[#allocation7 + $0x108] ss:$16 sps:$4 sm:$0xff]  }
  0x71   :  { %1031 = vmatprep.subr.bf16.mxu1 %v3070_v3  ;;  %v3158_v3 = vld [vmem:[#allocation7 + $0x308] ss:$16 sps:$4 sm:$0xff]  }
  0x72   :  { %935 = vmatmul.mubr.bf16.vlgmr.msra.gmra.mxu0 %v3575_v4 }
  0x73   :  { %978 = vmatmul.mubr.bf16.vlgmr.msra.gmra.mxu1 %v3577_v5  ;;  %989 = vmatpush1.bf16.msra.mxu0 %v3065_v6  ;;  %v3163_v6 = vld [vmem:[#allocation8 + $0xe4] ss:$16 sps:$4 sm:$0xff]  }
  0x74   :  { %1032 = vmatpush1.bf16.msra.mxu1 %v3068_v7  ;;  %990 = vmatprep.subr.bf16.mxu0 %v3073_v8  ;;  %v3166_v7 = vld [vmem:[#allocation8 + $0x2e4] ss:$16 sps:$4 sm:$0xff]   ;;  %v3161_v8 = vld [vmem:[#allocation8 + $0xe0] ss:$16 sps:$4 sm:$0xff]  }
  0x75   :  { %1033 = vmatprep.subr.bf16.mxu1 %v3076_v9  ;;  %1020 = vmatprep.mubr.bf16.mxu0 %v3061_v49  ;;  %v3136_v49 = vld [vmem:[#allocation7 + $0x38c] ss:$16 sps:$4 sm:$0xff]   ;;  %v3164_v9 = vld [vmem:[#allocation8 + $0x2e0] ss:$16 sps:$4 sm:$0xff]  }
  0x76   :  { %1063 = vmatprep.mubr.bf16.mxu1 %v3064_v51  ;;  %v3134_v51 = vld [vmem:[#allocation7 + $0x388] ss:$16 sps:$4 sm:$0xff]  }
  0x77   :  { %991 = vmatpush1.bf16.msra.mxu0 %v3071_v10  ;;  %v3169_v10 = vld [vmem:[#allocation8 + $0xc4] ss:$16 sps:$4 sm:$0xff]  }
  0x78   :  { %1034 = vmatpush1.bf16.msra.mxu1 %v3074_v11  ;;  %992 = vmatprep.subr.bf16.mxu0 %v3079_v12  ;;  %v3172_v11 = vld [vmem:[#allocation8 + $0x2c4] ss:$16 sps:$4 sm:$0xff]   ;;  %v3167_v12 = vld [vmem:[#allocation8 + $0xc0] ss:$16 sps:$4 sm:$0xff]  }
  0x79   :  { %1035 = vmatprep.subr.bf16.mxu1 %v3082_v13  ;;  %v3170_v13 = vld [vmem:[#allocation8 + $0x2c0] ss:$16 sps:$4 sm:$0xff]  }
  0x7b   :  { %993 = vmatpush1.bf16.msra.mxu0 %v3077_v14  ;;  %v3175_v14 = vld [vmem:[#allocation8 + $0xa4] ss:$16 sps:$4 sm:$0xff]  }
  0x7c   :  { %1036 = vmatpush1.bf16.msra.mxu1 %v3080_v15  ;;  %994 = vmatprep.subr.bf16.mxu0 %v3085_v16  ;;  %v3583_v15 = vld [vmem:[#allocation5 + $0x4] ss:$16 sps:$4 sm:$0xff]  }
  0x7d   :  { %1037 = vmatprep.subr.bf16.mxu1 %v3088_v17  ;;  %v3178_v16 = vld [vmem:[#allocation8 + $0x2a4] ss:$16 sps:$4 sm:$0xff]   ;;  %v3585_v17 = vld [vmem:[#allocation5 + $0xc] ss:$16 sps:$4 sm:$0xff]  }
  0x7f   :  { %995 = vmatpush1.bf16.msra.mxu0 %v3083_v18  ;;  %v3173_v18 = vld [vmem:[#allocation8 + $0xa0] ss:$16 sps:$4 sm:$0xff]  }
  0x80   :  { %1038 = vmatpush1.bf16.msra.mxu1 %v3086_v19  ;;  %996 = vmatprep.subr.bf16.mxu0 %v3091_v20  ;;  %v3176_v19 = vld [vmem:[#allocation8 + $0x2a0] ss:$16 sps:$4 sm:$0xff]  }
  0x81   :  { %1039 = vmatprep.subr.bf16.mxu1 %v3094_v21  ;;  %v3179_v20 = vld [vmem:[#allocation8 + $0x80] ss:$16 sps:$4 sm:$0xff]  }
  0x82   :  { %v3182_v21 = vld [vmem:[#allocation8 + $0x280] ss:$16 sps:$4 sm:$0xff]  }
  0x83   :  { %997 = vmatpush1.bf16.msra.mxu0 %v3089_v22  ;;  %v3187_v22 = vld [vmem:[#allocation8 + $0x64] ss:$16 sps:$4 sm:$0xff]  }
  0x84   :  { %1040 = vmatpush1.bf16.msra.mxu1 %v3092_v23  ;;  %998 = vmatprep.subr.bf16.mxu0 %v3097_v24  ;;  %v3190_v23 = vld [vmem:[#allocation8 + $0x264] ss:$16 sps:$4 sm:$0xff]   ;;  %v3185_v24 = vld [vmem:[#allocation8 + $0x60] ss:$16 sps:$4 sm:$0xff]  }
  0x85   :  { %1041 = vmatprep.subr.bf16.mxu1 %v3100_v25  ;;  %v3188_v25 = vld [vmem:[#allocation8 + $0x260] ss:$16 sps:$4 sm:$0xff]  }
  0x87   :  { %999 = vmatpush1.bf16.msra.mxu0 %v3095_v26  ;;  %v3193_v26 = vld [vmem:[#allocation8 + $0x44] ss:$16 sps:$4 sm:$0xff]  }
  0x88   :  { %1042 = vmatpush1.bf16.msra.mxu1 %v3098_v27  ;;  %1000 = vmatprep.subr.bf16.mxu0 %v3103_v28  ;;  %v3196_v27 = vld [vmem:[#allocation8 + $0x244] ss:$16 sps:$4 sm:$0xff]   ;;  %v3191_v28 = vld [vmem:[#allocation8 + $0x40] ss:$16 sps:$4 sm:$0xff]  }
  0x89   :  { %1043 = vmatprep.subr.bf16.mxu1 %v3106_v29  ;;  %v3194_v29 = vld [vmem:[#allocation8 + $0x240] ss:$16 sps:$4 sm:$0xff]  }
  0x8b   :  { %1001 = vmatpush1.bf16.msra.mxu0 %v3101_v30  ;;  %v3199_v30 = vld [vmem:[#allocation8 + $0x24] ss:$16 sps:$4 sm:$0xff]  }
  0x8c   :  { %1044 = vmatpush1.bf16.msra.mxu1 %v3104_v31  ;;  %1002 = vmatprep.subr.bf16.mxu0 %v3109_v32  ;;  %v3202_v31 = vld [vmem:[#allocation8 + $0x224] ss:$16 sps:$4 sm:$0xff]   ;;  %v3197_v32 = vld [vmem:[#allocation8 + $0x20] ss:$16 sps:$4 sm:$0xff]  }
  0x8d   :  { %1045 = vmatprep.subr.bf16.mxu1 %v3112_v33  ;;  %v3200_v33 = vld [vmem:[#allocation8 + $0x220] ss:$16 sps:$4 sm:$0xff]  }
  0x8f   :  { %1003 = vmatpush1.bf16.msra.mxu0 %v3107_v34  ;;  %v3205_v34 = vld [vmem:[#allocation8 + $0x4] ss:$16 sps:$4 sm:$0xff]  }
  0x90   :  { %1046 = vmatpush1.bf16.msra.mxu1 %v3110_v35  ;;  %1004 = vmatprep.subr.bf16.mxu0 %v3115_v36  ;;  %v3208_v35 = vld [vmem:[#allocation8 + $0x204] ss:$16 sps:$4 sm:$0xff]   ;;  %v3203_v36 = vld [vmem:[#allocation8] ss:$16 sps:$4 sm:$0xff]  }
  0x91   :  { %1047 = vmatprep.subr.bf16.mxu1 %v3118_v37  ;;  %v3206_v37 = vld [vmem:[#allocation8 + $0x200] ss:$16 sps:$4 sm:$0xff]  }
  0x93   :  { %1005 = vmatpush2.bf16.msra.mxu0 %v3113_v38  ;;  %v3211_v38 = vld [vmem:[#allocation8 + $0x1e4] ss:$16 sps:$4 sm:$0xff]  }
  0x94   :  { %1048 = vmatpush2.bf16.msra.mxu1 %v3116_v39  ;;  %1006 = vmatprep.subr.bf16.mxu0 %v3121_v40  ;;  %v3214_v39 = vld [vmem:[#allocation8 + $0x3e4] ss:$16 sps:$4 sm:$0xff]   ;;  %v3209_v40 = vld [vmem:[#allocation8 + $0x1e0] ss:$16 sps:$4 sm:$0xff]  }
  0x95   :  { %1049 = vmatprep.subr.bf16.mxu1 %v3124_v41  ;;  %v3212_v41 = vld [vmem:[#allocation8 + $0x3e0] ss:$16 sps:$4 sm:$0xff]  }
  0x97   :  { %1007 = vmatpush2.bf16.msra.mxu0 %v3119_v42  ;;  %v3217_v42 = vld [vmem:[#allocation8 + $0x1c4] ss:$16 sps:$4 sm:$0xff]  }
  0x98   :  { %1050 = vmatpush2.bf16.msra.mxu1 %v3122_v43  ;;  %1008 = vmatprep.subr.bf16.mxu0 %v3127_v44  ;;  %v3220_v43 = vld [vmem:[#allocation8 + $0x3c4] ss:$16 sps:$4 sm:$0xff]   ;;  %v3215_v44 = vld [vmem:[#allocation8 + $0x1c0] ss:$16 sps:$4 sm:$0xff]  }
  0x99   :  { %1051 = vmatprep.subr.bf16.mxu1 %v3130_v45  ;;  %v3218_v45 = vld [vmem:[#allocation8 + $0x3c0] ss:$16 sps:$4 sm:$0xff]  }
  0x9b   :  { %1009 = vmatpush2.bf16.msra.mxu0 %v3125_v46  ;;  %v3223_v46 = vld [vmem:[#allocation8 + $0x1a4] ss:$16 sps:$4 sm:$0xff]  }
  0x9c   :  { %1052 = vmatpush2.bf16.msra.mxu1 %v3128_v47  ;;  %1010 = vmatprep.subr.bf16.mxu0 %v3133_v48  ;;  %v3226_v47 = vld [vmem:[#allocation8 + $0x3a4] ss:$16 sps:$4 sm:$0xff]   ;;  %v3221_v48 = vld [vmem:[#allocation8 + $0x1a0] ss:$16 sps:$4 sm:$0xff]  }
  0x9d   :  { %1053 = vmatprep.subr.bf16.mxu1 %v3136_v49  ;;  %v3224_v49 = vld [vmem:[#allocation8 + $0x3a0] ss:$16 sps:$4 sm:$0xff]  }
  0x9f   :  { %1011 = vmatpush2.bf16.msra.mxu0 %v3131_v50  ;;  %v3229_v50 = vld [vmem:[#allocation8 + $0x184] ss:$16 sps:$4 sm:$0xff]  }
  0xa0   :  { %1054 = vmatpush2.bf16.msra.mxu1 %v3134_v51  ;;  %1012 = vmatprep.subr.bf16.mxu0 %v3139_v52  ;;  %v3232_v51 = vld [vmem:[#allocation8 + $0x384] ss:$16 sps:$4 sm:$0xff]   ;;  %v3227_v52 = vld [vmem:[#allocation8 + $0x180] ss:$16 sps:$4 sm:$0xff]  }
  0xa1   :  { %1055 = vmatprep.subr.bf16.mxu1 %v3142_v53  ;;  %v3230_v53 = vld [vmem:[#allocation8 + $0x380] ss:$16 sps:$4 sm:$0xff]  }
  0xa3   :  { %1013 = vmatpush2.bf16.msra.mxu0 %v3137_v54  ;;  %v3235_v54 = vld [vmem:[#allocation8 + $0x164] ss:$16 sps:$4 sm:$0xff]  }
  0xa4   :  { %1056 = vmatpush2.bf16.msra.mxu1 %v3140_v55  ;;  %1014 = vmatprep.subr.bf16.mxu0 %v3145_v56  ;;  %v3238_v55 = vld [vmem:[#allocation8 + $0x364] ss:$16 sps:$4 sm:$0xff]   ;;  %v3233_v56 = vld [vmem:[#allocation8 + $0x160] ss:$16 sps:$4 sm:$0xff]  }
  0xa5   :  { %1057 = vmatprep.subr.bf16.mxu1 %v3148_v57  ;;  %v3236_v57 = vld [vmem:[#allocation8 + $0x360] ss:$16 sps:$4 sm:$0xff]  }
  0xa7   :  { %1015 = vmatpush2.bf16.msra.mxu0 %v3143_v58  ;;  %v3241_v58 = vld [vmem:[#allocation8 + $0x144] ss:$16 sps:$4 sm:$0xff]  }
  0xa8   :  { %1058 = vmatpush2.bf16.msra.mxu1 %v3146_v59  ;;  %1016 = vmatprep.subr.bf16.mxu0 %v3151_v60  ;;  %v3244_v59 = vld [vmem:[#allocation8 + $0x344] ss:$16 sps:$4 sm:$0xff]   ;;  %v3239_v60 = vld [vmem:[#allocation8 + $0x140] ss:$16 sps:$4 sm:$0xff]  }
  0xa9   :  { %1059 = vmatprep.subr.bf16.mxu1 %v3154_v61  ;;  %v3242_v61 = vld [vmem:[#allocation8 + $0x340] ss:$16 sps:$4 sm:$0xff]  }
  0xab   :  { %1017 = vmatpush2.bf16.msra.mxu0 %v3149_v62  ;;  %v3247_v62 = vld [vmem:[#allocation8 + $0x124] ss:$16 sps:$4 sm:$0xff]  }
  0xac   :  { %1060 = vmatpush2.bf16.msra.mxu1 %v3152_v63  ;;  %1018 = vmatprep.subr.bf16.mxu0 %v3157_v0  ;;  %v3250_v63 = vld [vmem:[#allocation8 + $0x324] ss:$16 sps:$4 sm:$0xff]   ;;  %v3245_v0 = vld [vmem:[#allocation8 + $0x120] ss:$16 sps:$4 sm:$0xff]  }
  0xad   :  { %1061 = vmatprep.subr.bf16.mxu1 %v3160_v1  ;;  %v3248_v1 = vld [vmem:[#allocation8 + $0x320] ss:$16 sps:$4 sm:$0xff]  }
  0xaf   :  { %1019 = vmatpush2.bf16.msra.mxu0 %v3155_v2  ;;  %v3253_v2 = vld [vmem:[#allocation8 + $0x104] ss:$16 sps:$4 sm:$0xff]  }
  0xb0   :  { %1062 = vmatpush2.bf16.msra.mxu1 %v3158_v3  ;;  %1904 = vmatprep.subr.bf16.mxu0 %v3163_v6  ;;  %v3256_v3 = vld [vmem:[#allocation8 + $0x304] ss:$16 sps:$4 sm:$0xff]   ;;  %v3251_v6 = vld [vmem:[#allocation8 + $0x100] ss:$16 sps:$4 sm:$0xff]  }
  0xb1   :  { %1957 = vmatprep.subr.bf16.mxu1 %v3166_v7  ;;  %v3254_v7 = vld [vmem:[#allocation8 + $0x300] ss:$16 sps:$4 sm:$0xff]  }
  0xb2   :  { %1021 = vmatmul.mubr.bf16.vlgmr.msra.gmra.mxu0 %v3575_v4  ;;  %v3181_v4 = vld [vmem:[#allocation8 + $0x84] ss:$16 sps:$4 sm:$0xff]  }
  0xb3   :  { %1064 = vmatmul.mubr.bf16.vlgmr.msra.gmra.mxu1 %v3577_v5  ;;  %1905 = vmatpush1.bf16.msra.mxu0 %v3161_v8  ;;  %v3184_v5 = vld [vmem:[#allocation8 + $0x284] ss:$16 sps:$4 sm:$0xff]   ;;  %v3265_v8 = vld [vmem:[#allocation8 + $0xec] ss:$16 sps:$4 sm:$0xff]  }
  0xb4   :  { %1958 = vmatpush1.bf16.msra.mxu1 %v3164_v9  ;;  %1906 = vmatprep.subr.bf16.mxu0 %v3169_v10  ;;  %v3268_v9 = vld [vmem:[#allocation8 + $0x2ec] ss:$16 sps:$4 sm:$0xff]   ;;  %v3589_v10 = vld [vmem:[#allocation5] ss:$16 sps:$4 sm:$0xff]  }
  0xb5   :  { %1959 = vmatprep.subr.bf16.mxu1 %v3172_v11  ;;  %1936 = vmatprep.mubr.bf16.mxu0 %v3583_v15  ;;  %v3591_v11 = vld [vmem:[#allocation5 + $0x8] ss:$16 sps:$4 sm:$0xff]  }
  0xb6   :  { %1989 = vmatprep.mubr.bf16.mxu1 %v3585_v17 }
  0xb7   :  { %1907 = vmatpush1.bf16.msra.mxu0 %v3167_v12  ;;  %v3263_v12 = vld [vmem:[#allocation8 + $0xe8] ss:$16 sps:$4 sm:$0xff]  }
  0xb8   :  { %1960 = vmatpush1.bf16.msra.mxu1 %v3170_v13  ;;  %1908 = vmatprep.subr.bf16.mxu0 %v3175_v14  ;;  %v3266_v13 = vld [vmem:[#allocation8 + $0x2e8] ss:$16 sps:$4 sm:$0xff]   ;;  %v3271_v14 = vld [vmem:[#allocation8 + $0xcc] ss:$16 sps:$4 sm:$0xff]  }
  0xb9   :  { %1961 = vmatprep.subr.bf16.mxu1 %v3178_v16  ;;  %v3274_v16 = vld [vmem:[#allocation8 + $0x2cc] ss:$16 sps:$4 sm:$0xff]  }
  0xbb   :  { %1909 = vmatpush1.bf16.msra.mxu0 %v3173_v18  ;;  %v3593_v18 = vld [vmem:[#allocation5 + $0x24] ss:$16 sps:$4 sm:$0xff]  }
  0xbc   :  { %1962 = vmatpush1.bf16.msra.mxu1 %v3176_v19  ;;  %1910 = vmatprep.subr.bf16.mxu0 %v3181_v4  ;;  %v3595_v19 = vld [vmem:[#allocation5 + $0x2c] ss:$16 sps:$4 sm:$0xff]   ;;  %v3269_v4 = vld [vmem:[#allocation8 + $0xc8] ss:$16 sps:$4 sm:$0xff]  }
  0xbd   :  { %1963 = vmatprep.subr.bf16.mxu1 %v3184_v5  ;;  %v3272_v5 = vld [vmem:[#allocation8 + $0x2c8] ss:$16 sps:$4 sm:$0xff]  }
  0xbf   :  { %1911 = vmatpush1.bf16.msra.mxu0 %v3179_v20  ;;  %v3280_v20 = vld [vmem:[#allocation8 + $0xac] ss:$16 sps:$4 sm:$0xff]  }
  0xc0   :  { %1964 = vmatpush1.bf16.msra.mxu1 %v3182_v21  ;;  %1912 = vmatprep.subr.bf16.mxu0 %v3187_v22  ;;  %v3283_v21 = vld [vmem:[#allocation8 + $0x2ac] ss:$16 sps:$4 sm:$0xff]   ;;  %v3601_v22 = vld [vmem:[#allocation5 + $0x20] ss:$16 sps:$4 sm:$0xff]  }
  0xc1   :  { %1965 = vmatprep.subr.bf16.mxu1 %v3190_v23  ;;  %v3603_v23 = vld [vmem:[#allocation5 + $0x28] ss:$16 sps:$4 sm:$0xff]  }
  0xc3   :  { %1913 = vmatpush1.bf16.msra.mxu0 %v3185_v24  ;;  %v3278_v24 = vld [vmem:[#allocation8 + $0xa8] ss:$16 sps:$4 sm:$0xff]  }
  0xc4   :  { %1966 = vmatpush1.bf16.msra.mxu1 %v3188_v25  ;;  %1914 = vmatprep.subr.bf16.mxu0 %v3193_v26  ;;  %v3281_v25 = vld [vmem:[#allocation8 + $0x2a8] ss:$16 sps:$4 sm:$0xff]   ;;  %v3289_v26 = vld [vmem:[#allocation8 + $0x8c] ss:$16 sps:$4 sm:$0xff]  }
  0xc5   :  { %1967 = vmatprep.subr.bf16.mxu1 %v3196_v27  ;;  %v3292_v27 = vld [vmem:[#allocation8 + $0x28c] ss:$16 sps:$4 sm:$0xff]  }
  0xc7   :  { %1915 = vmatpush1.bf16.msra.mxu0 %v3191_v28  ;;  %v3287_v28 = vld [vmem:[#allocation8 + $0x88] ss:$16 sps:$4 sm:$0xff]  }
  0xc8   :  { %1968 = vmatpush1.bf16.msra.mxu1 %v3194_v29  ;;  %1916 = vmatprep.subr.bf16.mxu0 %v3199_v30  ;;  %v3290_v29 = vld [vmem:[#allocation8 + $0x288] ss:$16 sps:$4 sm:$0xff]   ;;  %v3295_v30 = vld [vmem:[#allocation8 + $0x6c] ss:$16 sps:$4 sm:$0xff]  }
  0xc9   :  { %1969 = vmatprep.subr.bf16.mxu1 %v3202_v31  ;;  %v3298_v31 = vld [vmem:[#allocation8 + $0x26c] ss:$16 sps:$4 sm:$0xff]  }
  0xcb   :  { %1917 = vmatpush1.bf16.msra.mxu0 %v3197_v32  ;;  %v3293_v32 = vld [vmem:[#allocation8 + $0x68] ss:$16 sps:$4 sm:$0xff]  }
  0xcc   :  { %1970 = vmatpush1.bf16.msra.mxu1 %v3200_v33  ;;  %1918 = vmatprep.subr.bf16.mxu0 %v3205_v34  ;;  %v3296_v33 = vld [vmem:[#allocation8 + $0x268] ss:$16 sps:$4 sm:$0xff]   ;;  %v3301_v34 = vld [vmem:[#allocation8 + $0x4c] ss:$16 sps:$4 sm:$0xff]  }
  0xcd   :  { %1971 = vmatprep.subr.bf16.mxu1 %v3208_v35  ;;  %v3304_v35 = vld [vmem:[#allocation8 + $0x24c] ss:$16 sps:$4 sm:$0xff]  }
  0xcf   :  { %1919 = vmatpush1.bf16.msra.mxu0 %v3203_v36  ;;  %v3299_v36 = vld [vmem:[#allocation8 + $0x48] ss:$16 sps:$4 sm:$0xff]  }
  0xd0   :  { %1972 = vmatpush1.bf16.msra.mxu1 %v3206_v37  ;;  %1920 = vmatprep.subr.bf16.mxu0 %v3211_v38  ;;  %v3302_v37 = vld [vmem:[#allocation8 + $0x248] ss:$16 sps:$4 sm:$0xff]   ;;  %v3307_v38 = vld [vmem:[#allocation8 + $0x2c] ss:$16 sps:$4 sm:$0xff]  }
  0xd1   :  { %1973 = vmatprep.subr.bf16.mxu1 %v3214_v39  ;;  %v3310_v39 = vld [vmem:[#allocation8 + $0x22c] ss:$16 sps:$4 sm:$0xff]  }
  0xd3   :  { %1921 = vmatpush2.bf16.msra.mxu0 %v3209_v40  ;;  %v3313_v40 = vld [vmem:[#allocation8 + $0xc] ss:$16 sps:$4 sm:$0xff]  }
  0xd4   :  { %1974 = vmatpush2.bf16.msra.mxu1 %v3212_v41  ;;  %1922 = vmatprep.subr.bf16.mxu0 %v3217_v42  ;;  %v3316_v41 = vld [vmem:[#allocation8 + $0x20c] ss:$16 sps:$4 sm:$0xff]   ;;  %v3311_v42 = vld [vmem:[#allocation8 + $0x8] ss:$16 sps:$4 sm:$0xff]  }
  0xd5   :  { %1975 = vmatprep.subr.bf16.mxu1 %v3220_v43  ;;  %v3314_v43 = vld [vmem:[#allocation8 + $0x208] ss:$16 sps:$4 sm:$0xff]  }
  0xd7   :  { %1923 = vmatpush2.bf16.msra.mxu0 %v3215_v44  ;;  %v3319_v44 = vld [vmem:[#allocation8 + $0x1ec] ss:$16 sps:$4 sm:$0xff]  }
  0xd8   :  { %1976 = vmatpush2.bf16.msra.mxu1 %v3218_v45  ;;  %1924 = vmatprep.subr.bf16.mxu0 %v3223_v46  ;;  %v3322_v45 = vld [vmem:[#allocation8 + $0x3ec] ss:$16 sps:$4 sm:$0xff]   ;;  %v3317_v46 = vld [vmem:[#allocation8 + $0x1e8] ss:$16 sps:$4 sm:$0xff]  }
  0xd9   :  { %1977 = vmatprep.subr.bf16.mxu1 %v3226_v47  ;;  %v3320_v47 = vld [vmem:[#allocation8 + $0x3e8] ss:$16 sps:$4 sm:$0xff]  }
  0xdb   :  { %1925 = vmatpush2.bf16.msra.mxu0 %v3221_v48  ;;  %v3325_v48 = vld [vmem:[#allocation8 + $0x1cc] ss:$16 sps:$4 sm:$0xff]  }
  0xdc   :  { %1978 = vmatpush2.bf16.msra.mxu1 %v3224_v49  ;;  %1926 = vmatprep.subr.bf16.mxu0 %v3229_v50  ;;  %v3328_v49 = vld [vmem:[#allocation8 + $0x3cc] ss:$16 sps:$4 sm:$0xff]   ;;  %v3323_v50 = vld [vmem:[#allocation8 + $0x1c8] ss:$16 sps:$4 sm:$0xff]  }
  0xdd   :  { %1979 = vmatprep.subr.bf16.mxu1 %v3232_v51  ;;  %v3326_v51 = vld [vmem:[#allocation8 + $0x3c8] ss:$16 sps:$4 sm:$0xff]  }
  0xdf   :  { %1927 = vmatpush2.bf16.msra.mxu0 %v3227_v52  ;;  %v3331_v52 = vld [vmem:[#allocation8 + $0x1ac] ss:$16 sps:$4 sm:$0xff]  }
  0xe0   :  { %1980 = vmatpush2.bf16.msra.mxu1 %v3230_v53  ;;  %1928 = vmatprep.subr.bf16.mxu0 %v3235_v54  ;;  %v3334_v53 = vld [vmem:[#allocation8 + $0x3ac] ss:$16 sps:$4 sm:$0xff]   ;;  %v3329_v54 = vld [vmem:[#allocation8 + $0x1a8] ss:$16 sps:$4 sm:$0xff]  }
  0xe1   :  { %1981 = vmatprep.subr.bf16.mxu1 %v3238_v55  ;;  %v3332_v55 = vld [vmem:[#allocation8 + $0x3a8] ss:$16 sps:$4 sm:$0xff]  }
  0xe3   :  { %1929 = vmatpush2.bf16.msra.mxu0 %v3233_v56  ;;  %v3337_v56 = vld [vmem:[#allocation8 + $0x18c] ss:$16 sps:$4 sm:$0xff]  }
  0xe4   :  { %1982 = vmatpush2.bf16.msra.mxu1 %v3236_v57  ;;  %1930 = vmatprep.subr.bf16.mxu0 %v3241_v58  ;;  %v3340_v57 = vld [vmem:[#allocation8 + $0x38c] ss:$16 sps:$4 sm:$0xff]   ;;  %v3335_v58 = vld [vmem:[#allocation8 + $0x188] ss:$16 sps:$4 sm:$0xff]  }
  0xe5   :  { %1983 = vmatprep.subr.bf16.mxu1 %v3244_v59  ;;  %v3338_v59 = vld [vmem:[#allocation8 + $0x388] ss:$16 sps:$4 sm:$0xff]  }
  0xe7   :  { %1931 = vmatpush2.bf16.msra.mxu0 %v3239_v60  ;;  %v3343_v60 = vld [vmem:[#allocation8 + $0x16c] ss:$16 sps:$4 sm:$0xff]  }
  0xe8   :  { %1984 = vmatpush2.bf16.msra.mxu1 %v3242_v61  ;;  %1932 = vmatprep.subr.bf16.mxu0 %v3247_v62  ;;  %v3346_v61 = vld [vmem:[#allocation8 + $0x36c] ss:$16 sps:$4 sm:$0xff]   ;;  %v3341_v62 = vld [vmem:[#allocation8 + $0x168] ss:$16 sps:$4 sm:$0xff]  }
  0xe9   :  { %1985 = vmatprep.subr.bf16.mxu1 %v3250_v63  ;;  %v3344_v63 = vld [vmem:[#allocation8 + $0x368] ss:$16 sps:$4 sm:$0xff]  }
  0xeb   :  { %1933 = vmatpush2.bf16.msra.mxu0 %v3245_v0  ;;  %v3349_v0 = vld [vmem:[#allocation8 + $0x14c] ss:$16 sps:$4 sm:$0xff]  }
  0xec   :  { %1986 = vmatpush2.bf16.msra.mxu1 %v3248_v1  ;;  %1934 = vmatprep.subr.bf16.mxu0 %v3253_v2  ;;  %v3352_v1 = vld [vmem:[#allocation8 + $0x34c] ss:$16 sps:$4 sm:$0xff]   ;;  %v3347_v2 = vld [vmem:[#allocation8 + $0x148] ss:$16 sps:$4 sm:$0xff]  }
  0xed   :  { %1987 = vmatprep.subr.bf16.mxu1 %v3256_v3  ;;  %v3350_v3 = vld [vmem:[#allocation8 + $0x348] ss:$16 sps:$4 sm:$0xff]  }
  0xef   :  { %1935 = vmatpush2.bf16.msra.mxu0 %v3251_v6  ;;  %v3355_v6 = vld [vmem:[#allocation8 + $0x12c] ss:$16 sps:$4 sm:$0xff]  }
  0xf0   :  { %1988 = vmatpush2.bf16.msra.mxu1 %v3254_v7  ;;  %2010 = vmatprep.subr.bf16.mxu0 %v3265_v8  ;;  %v3358_v7 = vld [vmem:[#allocation8 + $0x32c] ss:$16 sps:$4 sm:$0xff]   ;;  %v3353_v8 = vld [vmem:[#allocation8 + $0x128] ss:$16 sps:$4 sm:$0xff]  }
  0xf1   :  { %2063 = vmatprep.subr.bf16.mxu1 %v3268_v9  ;;  %v3356_v9 = vld [vmem:[#allocation8 + $0x328] ss:$16 sps:$4 sm:$0xff]  }
  0xf2   :  { %1937 = vmatmul.mubr.bf16.vlgmr.msra.gmra.mxu0 %v3589_v10 }
  0xf3   :  { %1990 = vmatmul.mubr.bf16.vlgmr.msra.gmra.mxu1 %v3591_v11  ;;  %2011 = vmatpush1.bf16.msra.mxu0 %v3263_v12  ;;  %v3361_v12 = vld [vmem:[#allocation8 + $0x10c] ss:$16 sps:$4 sm:$0xff]  }
  0xf4   :  { %2064 = vmatpush1.bf16.msra.mxu1 %v3266_v13  ;;  %2012 = vmatprep.subr.bf16.mxu0 %v3271_v14  ;;  %v3364_v13 = vld [vmem:[#allocation8 + $0x30c] ss:$16 sps:$4 sm:$0xff]   ;;  %v3359_v14 = vld [vmem:[#allocation8 + $0x108] ss:$16 sps:$4 sm:$0xff]  }
  0xf5   :  { %2065 = vmatprep.subr.bf16.mxu1 %v3274_v16  ;;  %1946 = vmatprep.mubr.bf16.mxu0 %v3593_v18  ;;  %v3362_v16 = vld [vmem:[#allocation8 + $0x308] ss:$16 sps:$4 sm:$0xff]  }
  0xf6   :  { %1999 = vmatprep.mubr.bf16.mxu1 %v3595_v19 }
  0xf7   :  { %2013 = vmatpush1.bf16.msra.mxu0 %v3269_v4  ;;  %v3511_v4 = vmov 0.0  }
  0xf8   :  { %2066 = vmatpush1.bf16.msra.mxu1 %v3272_v5  ;;  %2014 = vmatprep.subr.bf16.mxu0 %v3280_v20 }
  0xf9   :  { %2067 = vmatprep.subr.bf16.mxu1 %v3283_v21 }
  0xfa   :  { %1947 = vmatmul.mubr.bf16.gmra.mxu0 %v3601_v22 }
  0xfb   :  { %2000 = vmatmul.mubr.bf16.gmra.mxu1 %v3603_v23  ;;  %2015 = vmatpush1.bf16.msra.mxu0 %v3278_v24 }
  0xfc   :  { %2068 = vmatpush1.bf16.msra.mxu1 %v3281_v25  ;;  %2016 = vmatprep.subr.bf16.mxu0 %v3289_v26  ;;  %v220_v25 = vld [vmem:[%s3727_s3] sm:$0xf] }
  0xfd   :  { %2069 = vmatprep.subr.bf16.mxu1 %v3292_v27  ;;  %2042 = vmatprep.mubr.bf16.mxu0 %v3583_v15  ;;  %v3305_v15 = vld [vmem:[#allocation8 + $0x28] ss:$16 sps:$4 sm:$0xff]  }
  0xfe   :  { %2095 = vmatprep.mubr.bf16.mxu1 %v3585_v17  ;;  %v3308_v17 = vld [vmem:[#allocation8 + $0x228] ss:$16 sps:$4 sm:$0xff]  }
  0xff   :  { %2017 = vmatpush1.bf16.msra.mxu0 %v3287_v28 }
 0x100   :  { %2070 = vmatpush1.bf16.msra.mxu1 %v3290_v29  ;;  %2018 = vmatprep.subr.bf16.mxu0 %v3295_v30 }
 0x101   :  { %2071 = vmatprep.subr.bf16.mxu1 %v3298_v31 }
 0x103   :  { %2019 = vmatpush1.bf16.msra.mxu0 %v3293_v32 }
 0x104   :  { %2072 = vmatpush1.bf16.msra.mxu1 %v3296_v33  ;;  %2020 = vmatprep.subr.bf16.mxu0 %v3301_v34 }
 0x105   :  { %2073 = vmatprep.subr.bf16.mxu1 %v3304_v35 }
 0x107   :  { %2021 = vmatpush1.bf16.msra.mxu0 %v3299_v36 }
 0x108   :  { %2074 = vmatpush1.bf16.msra.mxu1 %v3302_v37  ;;  %2022 = vmatprep.subr.bf16.mxu0 %v3307_v38 }
 0x109   :  { %2075 = vmatprep.subr.bf16.mxu1 %v3310_v39 }
 0x10b   :  { %2023 = vmatpush1.bf16.msra.mxu0 %v3305_v15 }
 0x10c   :  { %2076 = vmatpush1.bf16.msra.mxu1 %v3308_v17  ;;  %2024 = vmatprep.subr.bf16.mxu0 %v3313_v40 }
 0x10d   :  { %2077 = vmatprep.subr.bf16.mxu1 %v3316_v41 }
 0x10f   :  { %2025 = vmatpush1.bf16.msra.mxu0 %v3311_v42 }
 0x110   :  { %2078 = vmatpush1.bf16.msra.mxu1 %v3314_v43  ;;  %2026 = vmatprep.subr.bf16.mxu0 %v3319_v44  ;;  %v3655_v44 = vld [vmem:[%s3729_s5] sm:$0xf]  ;;  %s3513_s5 = smov [#allocation10]  }
 0x111   :  { %2079 = vmatprep.subr.bf16.mxu1 %v3322_v45  ;;  %s2590_s18 = sshll.u32 %s3513_s5, 4  ;;  %s2591_s18 = int_to_ptr.vmem [resolvable:$true] %s2590_s18 }
 0x112   :  { %s3477_s19 = scalar_lea.vmem %s2591_s18, 256  ;;  %p3482_p7 = scmp.lt.s32.totalorder %s2591_s18, %s2591_s18 }
 0x113   :  { %2027 = vmatpush2.bf16.msra.mxu0 %v3317_v46  ;;  %p3478_p6 = scmp.ne.s32.totalorder %s2591_s18, %s3477_s19  ;;  %p3483_p8 = scmp.lt.s32.totalorder %s3477_s19, %s3477_s19 }
 0x114   :  { %2080 = vmatpush2.bf16.msra.mxu1 %v3320_v47  ;;  %2028 = vmatprep.subr.bf16.mxu0 %v3325_v48 }
 0x115   :  { %2081 = vmatprep.subr.bf16.mxu1 %v3328_v49  ;;  %p3484_p9 = por %p3483_p8, %p3482_p7 }
 0x117   :  { %2029 = vmatpush2.bf16.msra.mxu0 %v3323_v50  ;;  %p3485_p10 = pnand %p3484_p9, %p3478_p6 }
 0x118   :  { %2082 = vmatpush2.bf16.msra.mxu1 %v3326_v51  ;;  %2030 = vmatprep.subr.bf16.mxu0 %v3331_v52 }
 0x119   :  { %2083 = vmatprep.subr.bf16.mxu1 %v3334_v53 }
 0x11b   :  { %2031 = vmatpush2.bf16.msra.mxu0 %v3329_v54 }
 0x11c   :  { %2084 = vmatpush2.bf16.msra.mxu1 %v3332_v55  ;;  %2032 = vmatprep.subr.bf16.mxu0 %v3337_v56 }
 0x11d   :  { %2085 = vmatprep.subr.bf16.mxu1 %v3340_v57 }
 0x11f   :  { %2033 = vmatpush2.bf16.msra.mxu0 %v3335_v58 }
 0x120   :  { %2086 = vmatpush2.bf16.msra.mxu1 %v3338_v59  ;;  %2034 = vmatprep.subr.bf16.mxu0 %v3343_v60 }
 0x121   :  { %2087 = vmatprep.subr.bf16.mxu1 %v3346_v61 }
 0x123   :  { %2035 = vmatpush2.bf16.msra.mxu0 %v3341_v62 }
 0x124   :  { %2088 = vmatpush2.bf16.msra.mxu1 %v3344_v63  ;;  %2036 = vmatprep.subr.bf16.mxu0 %v3349_v0 }
 0x125   :  { %2089 = vmatprep.subr.bf16.mxu1 %v3352_v1 }
 0x127   :  { %2037 = vmatpush2.bf16.msra.mxu0 %v3347_v2 }
 0x128   :  { %2090 = vmatpush2.bf16.msra.mxu1 %v3350_v3  ;;  %2038 = vmatprep.subr.bf16.mxu0 %v3355_v6 }
 0x129   :  { %2091 = vmatprep.subr.bf16.mxu1 %v3358_v7 }
 0x12b   :  { %2039 = vmatpush2.bf16.msra.mxu0 %v3353_v8 }
 0x12c   :  { %2092 = vmatpush2.bf16.msra.mxu1 %v3356_v9  ;;  %2040 = vmatprep.subr.bf16.mxu0 %v3361_v12 }
 0x12d   :  { %2093 = vmatprep.subr.bf16.mxu1 %v3364_v13 }
 0x12f   :  { %2041 = vmatpush2.bf16.msra.mxu0 %v3359_v14 }
 0x130   :  { %2094 = vmatpush2.bf16.msra.mxu1 %v3362_v16  ;;  %2904 = vmatprep.subr.bf16.mxu0 %v3511_v4 }
 0x131   :  { %2910 = vmatprep.subr.bf16.mxu1 %v3511_v4 }
 0x132   :  { %2043 = vmatmul.mubr.bf16.vlgmr.msra.gmra.mxu0 %v3589_v10  ;;  %v936_v10 = vpop.f32.mrf.mxu0 }
 0x133   :  { %2096 = vmatmul.mubr.bf16.vlgmr.msra.gmra.mxu1 %v3591_v11  ;;  %2052 = vmatprep.mubr.bf16.mxu0 %v3593_v18  ;;  %v979_v11 = vpop.f32.mrf.mxu1  ;;  %v222_v18 = vlaneseq }
 0x134   :  { %2105 = vmatprep.mubr.bf16.mxu1 %v3595_v19  ;;  %v3621_v19 = vpop.f32.mrf.mxu0 }
 0x135   :  { %v3623_v5 = vpop.f32.mrf.mxu1  ;;  %v3625_v20 = vshrl.u32 %v222_v18, 7 }
 0x137   :  { %v232_v21 = vsub.s32 2, %v3625_v20  ;;  %v236_v24 = vsub.s32 3, %v3625_v20  ;;  %v224_v45 = vsub.s32 0, %v3625_v20  ;;  %v228_v55 = vsub.s32 1, %v3625_v20 }
 0x139   :  { %v233_v26 = vrot.slane %v220_v25, %v232_v21  ;;  %v237_v29 = vrot.slane %v220_v25, %v236_v24  ;;  %v1207_v46 = vrot.slane %v3655_v44, %v224_v45  ;;  %v225_v52 = vrot.slane %v220_v25, %v224_v45 }
 0x13a   :  { %2053 = vmatmul.mubr.bf16.gmra.mxu0 %v3601_v22  ;;  %v3628_v22 = vpop.f32.mrf.mxu0  ;;  %v1211_v59 = vrot.slane %v3655_v44, %v228_v55  ;;  %v229_v12 = vrot.slane %v220_v25, %v228_v55  ;;  %v1219_v55 = vrot.slane %v3655_v44, %v236_v24 }
 0x13b   :  { %2106 = vmatmul.mubr.bf16.gmra.mxu1 %v3603_v23  ;;  %2906 = vmatprep.mubr.msk.bf16.mxu0 %vm3512_vm0, %v3511_v4  ;;  %v3630_v23 = vpop.f32.mrf.mxu1  ;;  %v937_v62 = vadd.f32 %v936_v10, %v225_v52 }
 0x13c   :  { %2912 = vmatprep.mubr.msk.bf16.mxu1 %vm3512_vm0, %v3511_v4  ;;  %v3638_v27 = vpop.f32.mrf.mxu0 }
 0x13d   :  { %v3640_v28 = vpop.f32.mrf.mxu1  ;;  %v980_v9 = vadd.f32 %v979_v11, %v937_v62  ;;  %v943_v45 = vadd.f32 %v3638_v27, %v229_v12  ;;  %v1215_v27 = vrot.slane %v3655_v44, %v232_v21 }
 0x172   :  { %v1022_v30 = vpop.f32.mrf.mxu0 }
 0x173   :  { %v1065_v31 = vpop.f32.mrf.mxu1  ;;  %v1023_v32 = vadd.f32 %v1022_v30, %v233_v26 }
 0x174   :  { %v1024_v33 = vpop.f32.mrf.mxu0 }
 0x175   :  { %v1067_v34 = vpop.f32.mrf.mxu1  ;;  %v3644_v35 = vadd.f32 %v1065_v31, %v1023_v32  ;;  %v1025_v36 = vadd.f32 %v1024_v33, %v237_v29  ;;  %v2880_v33 = vpack.c.bf16 %v980_v9, %v980_v9 }
 0x176   :  { %v1026_v37 = vpop.f32.mrf.mxu0 }
 0x177   :  { %v1069_v38 = vpop.f32.mrf.mxu1  ;;  %v3646_v39 = vadd.f32 %v1067_v34, %v1025_v36  ;;  %v1027_v15 = vadd.f32 %v1026_v37, %v233_v26  ;;  %v939_v34 = vadd.f32 %v3621_v19, %v229_v12  ;;  %v941_v36 = vadd.f32 %v3628_v22, %v225_v52 }
 0x178   :  { %v1028_v17 = vpop.f32.mrf.mxu0 }
 0x179   :  { %v3648_v40 = vadd.f32 %v1069_v38, %v1027_v15  ;;  %v1029_v41 = vadd.f32 %v1028_v17, %v237_v29  ;;  %v1071_v42 = vpop.f32.mrf.mxu1  ;;  %v982_v17 = vadd.f32 %v3623_v5, %v939_v34  ;;  %v986_v5 = vadd.f32 %v3640_v28, %v943_v45 }
 0x17b   :  { %v3650_v43 = vadd.f32 %v1071_v42, %v1029_v41  ;;  %v984_v41 = vadd.f32 %v3630_v23, %v941_v36  ;;  %v2882_v22 = vpack.c.bf16 %v982_v17, %v982_v17  ;;  %v2883_v23 = vpack.c.bf16 %v986_v5, %v986_v5 }
 0x17d   :  { %v2881_v42 = vpack.c.bf16 %v984_v41, %v984_v41 }
 0x1b2   :  { %v1938_v47 = vpop.f32.mrf.mxu0 }
 0x1b3   :  { %v1991_v48 = vpop.f32.mrf.mxu1  ;;  %v1939_v51 = vadd.f32 %v1938_v47, %v1207_v46 }
 0x1b4   :  { %v1940_v49 = vpop.f32.mrf.mxu0 }
 0x1b5   :  { %v1993_v50 = vpop.f32.mrf.mxu1  ;;  %v1992_v60 = vadd.f32 %v1991_v48, %v1939_v51  ;;  %v1941_v8 = vadd.f32 %v1940_v49, %v1211_v59 }
 0x1b6   :  { %v1942_v53 = vpop.f32.mrf.mxu0 }
 0x1b7   :  { %v1995_v54 = vpop.f32.mrf.mxu1  ;;  %v1943_v56 = vadd.f32 %v1942_v53, %v1207_v46  ;;  %v1994_v10 = vadd.f32 %v1993_v50, %v1941_v8  ;;  %v2884_v8 = vpack.c.bf16 %v3644_v35, %v3644_v35  ;;  %v2885_v35 = vpack.c.bf16 %v3648_v40, %v3648_v40 }
 0x1b8   :  { %v1944_v57 = vpop.f32.mrf.mxu0 }
 0x1b9   :  { %v1997_v58 = vpop.f32.mrf.mxu1  ;;  %v1996_v61 = vadd.f32 %v1995_v54, %v1943_v56  ;;  %v1945_v2 = vadd.f32 %v1944_v57, %v1211_v59 }
 0x1ba   :  { %v1948_v63 = vpop.f32.mrf.mxu0 }
 0x1bb   :  { %v2001_v0 = vpop.f32.mrf.mxu1  ;;  %v2120_v1 = vpack.c.bf16 %v1996_v61, %v1992_v60  ;;  %v1949_v3 = vadd.f32 %v1948_v63, %v1207_v46  ;;  %v1998_v16 = vadd.f32 %v1997_v58, %v1945_v2 }
 0x1bc   :  { %v1950_v6 = vpop.f32.mrf.mxu0 }
 0x1bd   :  { %v2003_v7 = vpop.f32.mrf.mxu1  ;;  %2905 = vmatpush3.bf16.xpose.msra.mxu0 %v2120_v1  ;;  %v2002_v18 = vadd.f32 %v2001_v0, %v1949_v3  ;;  %v1951_v30 = vadd.f32 %v1950_v6, %v1211_v59  ;;  %v2121_v11 = vpack.c.bf16 %v1998_v16, %v1994_v10 }
 0x1be   :  { %v1952_v13 = vpop.f32.mrf.mxu0  ;;  %2916 = vmatprep.subr.bf16.mxu0 %v3511_v4 }
 0x1bf   :  { %v2005_v14 = vpop.f32.mrf.mxu1  ;;  %v1953_v26 = vadd.f32 %v1952_v13, %v1207_v46  ;;  %v2004_v38 = vadd.f32 %v2003_v7, %v1951_v30  ;;  %v2887_v30 = vpack.c.bf16 %v3650_v43, %v3650_v43 }
 0x1c0   :  { %v1954_v29 = vpop.f32.mrf.mxu0 }
 0x1c1   :  { %v2006_v31 = vadd.f32 %v2005_v14, %v1953_v26  ;;  %v1955_v32 = vadd.f32 %v1954_v29, %v1211_v59  ;;  %v2007_v37 = vpop.f32.mrf.mxu1  ;;  %v2886_v29 = vpack.c.bf16 %v3646_v39, %v3646_v39 }
 0x1c3   :  { %v2124_v25 = vpack.c.bf16 %v2006_v31, %v2002_v18  ;;  %v2008_v15 = vadd.f32 %v2007_v37, %v1955_v32 }
 0x1c4   :  { %2907 = vmatmul.mubr.bf16.vlgmr.msra.gmra.mxu0 %v2880_v33 }
 0x1c5   :  { %2911 = vmatpush3.bf16.xpose.msra.mxu1 %v2124_v25  ;;  %2917 = vmatpush3.bf16.xpose.msra.mxu0 %v2121_v11  ;;  %v2125_v19 = vpack.c.bf16 %v2008_v15, %v2004_v38 }
 0x1c6   :  { %2918 = vmatprep.mubr.msk.bf16.mxu0 %vm3512_vm0, %v3511_v4  ;;  %2922 = vmatprep.subr.bf16.mxu1 %v3511_v4 }
 0x1c7   :  { %2928 = vmatprep.subr.bf16.mxu0 %v3511_v4 }
 0x1cc   :  { %2913 = vmatmul.mubr.bf16.vlgmr.msra.gmra.mxu1 %v2881_v42  ;;  %2919 = vmatmul.mubr.bf16.vlgmr.msra.gmra.mxu0 %v2882_v22 }
 0x1cd   :  { %2923 = vmatpush3.bf16.xpose.msra.mxu1 %v2125_v19  ;;  %2924 = vmatprep.mubr.msk.bf16.mxu1 %vm3512_vm0, %v3511_v4 }
 0x1ce   :  { %2930 = vmatprep.mubr.msk.bf16.mxu0 %vm3512_vm0, %v3511_v4  ;;  %2934 = vmatprep.subr.bf16.mxu1 %v3511_v4 }
 0x1d4   :  { %2925 = vmatmul.mubr.bf16.vlgmr.msra.gmra.mxu1 %v2883_v23 }
 0x1d5   :  { %2936 = vmatprep.mubr.msk.bf16.mxu1 %vm3512_vm0, %v3511_v4 }
 0x1f2   :  { %v2044_v46 = vpop.f32.mrf.mxu0 }
 0x1f3   :  { %v2097_v47 = vpop.f32.mrf.mxu1  ;;  %v2045_v50 = vadd.f32 %v2044_v46, %v1215_v27 }
 0x1f4   :  { %v2046_v48 = vpop.f32.mrf.mxu0 }
 0x1f5   :  { %v2099_v49 = vpop.f32.mrf.mxu1  ;;  %v2098_v56 = vadd.f32 %v2097_v47, %v2045_v50  ;;  %v2047_v63 = vadd.f32 %v2046_v48, %v1219_v55 }
 0x1f6   :  { %v2048_v28 = vpop.f32.mrf.mxu0 }
 0x1f7   :  { %v2101_v51 = vpop.f32.mrf.mxu1  ;;  %v2049_v52 = vadd.f32 %v2048_v28, %v1215_v27  ;;  %v2100_v7 = vadd.f32 %v2099_v49, %v2047_v63 }
 0x1f8   :  { %v2050_v53 = vpop.f32.mrf.mxu0 }
 0x1f9   :  { %v2103_v54 = vpop.f32.mrf.mxu1  ;;  %v2102_v57 = vadd.f32 %v2101_v51, %v2049_v52  ;;  %v2051_v21 = vadd.f32 %v2050_v53, %v1219_v55 }
 0x1fa   :  { %v2054_v58 = vpop.f32.mrf.mxu0 }
 0x1fb   :  { %v2107_v59 = vpop.f32.mrf.mxu1  ;;  %v2122_v60 = vpack.c.bf16 %v2102_v57, %v2098_v56  ;;  %v2055_v0 = vadd.f32 %v2054_v58, %v1215_v27  ;;  %v2104_v2 = vadd.f32 %v2103_v54, %v2051_v21 }
 0x1fc   :  { %v2056_v61 = vpop.f32.mrf.mxu0 }
 0x1fd   :  { %v2109_v62 = vpop.f32.mrf.mxu1  ;;  %2929 = vmatpush3.bf16.xpose.msra.mxu0 %v2122_v60  ;;  %v2108_v24 = vadd.f32 %v2107_v59, %v2055_v0  ;;  %v2123_v9 = vpack.c.bf16 %v2104_v2, %v2100_v7  ;;  %v2057_v14 = vadd.f32 %v2056_v61, %v1219_v55 }
 0x1fe   :  { %v2058_v1 = vpop.f32.mrf.mxu0  ;;  %2940 = vmatprep.subr.bf16.mxu0 %v3511_v4 }
 0x1ff   :  { %v2059_v3 = vadd.f32 %v2058_v1, %v1215_v27  ;;  %v2111_v6 = vpop.f32.mrf.mxu1  ;;  %v2110_v26 = vadd.f32 %v2109_v62, %v2057_v14 }
 0x200   :  { %v2060_v20 = vpop.f32.mrf.mxu0 }
 0x201   :  { %v2112_v44 = vadd.f32 %v2111_v6, %v2059_v3  ;;  %v2061_v13 = vadd.f32 %v2060_v20, %v1219_v55  ;;  %v2113_v16 = vpop.f32.mrf.mxu1 }
 0x203   :  { %v2126_v12 = vpack.c.bf16 %v2112_v44, %v2108_v24  ;;  %v2114_v18 = vadd.f32 %v2113_v16, %v2061_v13 }
 0x204   :  { %2931 = vmatmul.mubr.bf16.vlgmr.msra.gmra.mxu0 %v2884_v8 }
 0x205   :  { %2935 = vmatpush3.bf16.xpose.msra.mxu1 %v2126_v12  ;;  %2941 = vmatpush3.bf16.xpose.msra.mxu0 %v2123_v9  ;;  %v2127_v10 = vpack.c.bf16 %v2114_v18, %v2110_v26 }
 0x206   :  { %2942 = vmatprep.mubr.msk.bf16.mxu0 %vm3512_vm0, %v3511_v4  ;;  %2946 = vmatprep.subr.bf16.mxu1 %v3511_v4 }
 0x20c   :  { %2937 = vmatmul.mubr.bf16.vlgmr.msra.gmra.mxu1 %v2885_v35  ;;  %2943 = vmatmul.mubr.bf16.vlgmr.msra.gmra.mxu0 %v2886_v29 }
 0x20d   :  { %2947 = vmatpush3.bf16.xpose.msra.mxu1 %v2127_v10  ;;  %2948 = vmatprep.mubr.msk.bf16.mxu1 %vm3512_vm0, %v3511_v4 }
 0x214   :  { %2949 = vmatmul.mubr.bf16.vlgmr.msra.gmra.mxu1 %v2887_v30 }
 0x284   :  { %v2169_v31 = vpop.f32.mrf.mxu0 }
 0x285   :  { %v2215_v32 = vmul.f32 0.088388346, %v2169_v31 }
 0x286   :  { %v2908_v33 = vpop.f32.mrf.mxu0 }
 0x287   :  { %v2218_v39 = vsel %vm2217_vm1, %v2215_v32, -inf }
 0x288   :  { %2219 = vmax.xlane.f32.xlu0 %v2218_v39  ;;  %v2172_v34 = vpop.f32.mrf.mxu0 }
 0x28a   :  { %v2909_v40 = vpop.f32.mrf.mxu0 }
 0x28c   :  { %v2209_v36 = vpop.f32.mrf.mxu1  ;;  %v2283_v37 = vpop.f32.mrf.mxu0 }
 0x28d   :  { %v2216_v11 = vmul.f32 0.088388346, %v2209_v36  ;;  %v2329_v25 = vmul.f32 0.088388346, %v2283_v37 }
 0x28e   :  { %v2914_v38 = vpop.f32.mrf.mxu1  ;;  %v2920_v15 = vpop.f32.mrf.mxu0 }
 0x28f   :  { %v2221_v4 = vsel %vm2217_vm1, %v2216_v11, -inf  ;;  %v2331_v43 = vsel %vm2217_vm1, %v2329_v25, -inf }
 0x290   :  { %v2212_v17 = vpop.f32.mrf.mxu1  ;;  %2222 = vmax.xlane.f32.xlu0 %v2221_v4  ;;  %2332 = vmax.xlane.f32.xlu1 %v2331_v43  ;;  %v2286_v41 = vpop.f32.mrf.mxu0 }
 0x292   :  { %v2915_v19 = vpop.f32.mrf.mxu1  ;;  %v2921_v22 = vpop.f32.mrf.mxu0 }
 0x294   :  { %v2323_v42 = vpop.f32.mrf.mxu1 }
 0x295   :  { %v2330_v45 = vmul.f32 0.088388346, %v2323_v42 }
 0x296   :  { %v2926_v5 = vpop.f32.mrf.mxu1 }
 0x297   :  { %v2334_v23 = vsel %vm2217_vm1, %v2330_v45, -inf }
 0x298   :  { %v2326_v27 = vpop.f32.mrf.mxu1  ;;  %2335 = vmax.xlane.f32.xlu1 %v2334_v23 }
 0x29a   :  { %v2927_v46 = vpop.f32.mrf.mxu1 }
 0x2c4   :  { %v2396_v47 = vpop.f32.mrf.mxu0 }
 0x2c5   :  { %v2442_v48 = vmul.f32 0.088388346, %v2396_v47 }
 0x2c6   :  { %v2932_v49 = vpop.f32.mrf.mxu0 }
 0x2c7   :  { %v2444_v50 = vsel %vm2217_vm1, %v2442_v48, -inf }
 0x2c8   :  { %2445 = vmax.xlane.f32.xlu0 %v2444_v50  ;;  %v2399_v28 = vpop.f32.mrf.mxu0 }
 0x2ca   :  { %v2933_v51 = vpop.f32.mrf.mxu0 }
 0x2cc   :  { %v2436_v52 = vpop.f32.mrf.mxu1  ;;  %v2509_v53 = vpop.f32.mrf.mxu0 }
 0x2cd   :  { %v2443_v54 = vmul.f32 0.088388346, %v2436_v52  ;;  %v2555_v55 = vmul.f32 0.088388346, %v2509_v53 }
 0x2ce   :  { %v2938_v56 = vpop.f32.mrf.mxu1  ;;  %v2944_v57 = vpop.f32.mrf.mxu0 }
 0x2cf   :  { %v2447_v58 = vsel %vm2217_vm1, %v2443_v54, -inf  ;;  %v2557_v59 = vsel %vm2217_vm1, %v2555_v55, -inf }
 0x2d0   :  { %v2439_v60 = vpop.f32.mrf.mxu1  ;;  %2448 = vmax.xlane.f32.xlu1 %v2447_v58  ;;  %2558 = vmax.xlane.f32.xlu0 %v2557_v59  ;;  %v2512_v21 = vpop.f32.mrf.mxu0 }
 0x2d2   :  { %v2939_v61 = vpop.f32.mrf.mxu1  ;;  %v2945_v62 = vpop.f32.mrf.mxu0 }
 0x2d4   :  { %v2549_v63 = vpop.f32.mrf.mxu1 }
 0x2d5   :  { %v2556_v0 = vmul.f32 0.088388346, %v2549_v63 }
 0x2d6   :  { %v2950_v1 = vpop.f32.mrf.mxu1 }
 0x2d7   :  { %v2560_v2 = vsel %vm2217_vm1, %v2556_v0, -inf }
 0x2d8   :  { %v2552_v3 = vpop.f32.mrf.mxu1  ;;  %2561 = vmax.xlane.f32.xlu1 %v2560_v2 }
 0x2da   :  { %v2951_v6 = vpop.f32.mrf.mxu1 }
 0x311   :  { %v2220_v20 = vpop.xlane.xlu0 %2219 }
 0x312   :  { %v2224_v7 = vsub.f32 %v2215_v32, %v2220_v20 }
 0x314   :  { %v2226_v24 = vmul.f32 1.442695, %v2224_v7 }
 0x316   :  { %3365 = vpow2.f32 %v2226_v24 }
 0x319   :  { %v2223_v44 = vpop.xlane.xlu0 %2222  ;;  %v2333_v8 = vpop.xlane.xlu1 %2332 }
 0x31a   :  { %v2225_v9 = vsub.f32 %v2216_v11, %v2223_v44  ;;  %v2337_v12 = vsub.f32 %v2329_v25, %v2333_v8 }
 0x31c   :  { %v2228_v13 = vmul.f32 1.442695, %v2225_v9  ;;  %v2339_v14 = vmul.f32 1.442695, %v2337_v12 }
 0x31e   :  { %3367 = vpow2.f32 %v2228_v13 }
 0x31f   :  { %3369 = vpow2.f32 %v2339_v14 }
 0x321   :  { %v2336_v16 = vpop.xlane.xlu1 %2335 }
 0x322   :  { %v2338_v18 = vsub.f32 %v2330_v45, %v2336_v16 }
 0x323   :  { %v3366_v26 = vpop.eup %3365 }
 0x324   :  { %v2341_v29 = vmul.f32 1.442695, %v2338_v18  ;;  %v2230_v35 = vsel %vm2217_vm1, %v3366_v26, 0.0 }
 0x325   :  { %2231 = vadd.xlane.f32.xlu0 %v2230_v35 }
 0x326   :  { %3371 = vpow2.f32 %v2341_v29 }
 0x32b   :  { %v3708_v10 = vpop.eup %3367 }
 0x32c   :  { %v3370_v30 = vpop.eup %3369  ;;  %v2233_v31 = vsel %vm2217_vm1, %v3708_v10, 0.0 }
 0x32d   :  { %2234 = vadd.xlane.f32.xlu1 %v2233_v31  ;;  %v2343_v32 = vsel %vm2217_vm1, %v3370_v30, 0.0 }
 0x32e   :  { %2344 = vadd.xlane.f32.xlu0 %v2343_v32 }
 0x333   :  { %v3372_v33 = vpop.eup %3371 }
 0x334   :  { %v2346_v39 = vsel %vm2217_vm1, %v3372_v33, 0.0 }
 0x335   :  { %2347 = vadd.xlane.f32.xlu1 %v2346_v39 }
 0x351   :  { %v2446_v34 = vpop.xlane.xlu0 %2445 }
 0x352   :  { %v2450_v40 = vsub.f32 %v2442_v48, %v2446_v34 }
 0x354   :  { %v2452_v36 = vmul.f32 1.442695, %v2450_v40 }
 0x356   :  { %3373 = vpow2.f32 %v2452_v36 }
 0x359   :  { %v2449_v37 = vpop.xlane.xlu1 %2448  ;;  %v2559_v11 = vpop.xlane.xlu0 %2558 }
 0x35a   :  { %v2451_v25 = vsub.f32 %v2443_v54, %v2449_v37  ;;  %v2563_v38 = vsub.f32 %v2555_v55, %v2559_v11 }
 0x35c   :  { %v2454_v15 = vmul.f32 1.442695, %v2451_v25  ;;  %v2565_v4 = vmul.f32 1.442695, %v2563_v38 }
 0x35e   :  { %3375 = vpow2.f32 %v2454_v15 }
 0x35f   :  { %3377 = vpow2.f32 %v2565_v4 }
 0x361   :  { %v2562_v43 = vpop.xlane.xlu1 %2561 }
 0x362   :  { %v2564_v17 = vsub.f32 %v2556_v0, %v2562_v43 }
 0x363   :  { %v3374_v41 = vpop.eup %3373 }
 0x364   :  { %v2567_v19 = vmul.f32 1.442695, %v2564_v17  ;;  %v2456_v22 = vsel %vm2217_vm1, %v3374_v41, 0.0 }
 0x365   :  { %2457 = vadd.xlane.f32.xlu0 %v2456_v22 }
 0x366   :  { %3379 = vpow2.f32 %v2567_v19 }
 0x36b   :  { %v3376_v42 = vpop.eup %3375 }
 0x36c   :  { %v3378_v45 = vpop.eup %3377  ;;  %v2459_v5 = vsel %vm2217_vm1, %v3376_v42, 0.0 }
 0x36d   :  { %2460 = vadd.xlane.f32.xlu1 %v2459_v5  ;;  %v2569_v23 = vsel %vm2217_vm1, %v3378_v45, 0.0 }
 0x36e   :  { %2570 = vadd.xlane.f32.xlu0 %v2569_v23 }
 0x373   :  { %v3380_v27 = vpop.eup %3379 }
 0x374   :  { %v2572_v46 = vsel %vm2217_vm1, %v3380_v27, 0.0 }
 0x375   :  { %2573 = vadd.xlane.f32.xlu1 %v2572_v46 }
 0x3ae   :  { %v2232_v47 = vpop.xlane.xlu0 %2231 }
 0x3b6   :  { %v2235_v49 = vpop.xlane.xlu1 %2234 }
 0x3b7   :  { %v2345_v48 = vpop.xlane.xlu0 %2344 }
 0x3b8   :  { %3381 = vrcp.f32 %v2345_v48 }
 0x3b9   :  { %3383 = vrcp.f32 %v2232_v47 }
 0x3be   :  { %v2348_v28 = vpop.xlane.xlu1 %2347 }
 0x3c5   :  { %v3382_v53 = vpop.eup %3381 }
 0x3c6   :  { %v3384_v54 = vpop.eup %3383  ;;  %v2351_v57 = vmul.f32 %v3382_v53, %v3370_v30 }
 0x3c7   :  { %v2238_v58 = vmul.f32 %v3384_v54, %v3366_v26 }
 0x3c9   :  { %v2353_v61 = vadd.f32 %v2351_v57, %v2238_v58 }
 0x3ee   :  { %v2458_v50 = vpop.xlane.xlu0 %2457 }
 0x3ef   :  { %3385 = vrcp.f32 %v2458_v50 }
 0x3f0   :  { %3387 = vrcp.f32 %v2235_v49 }
 0x3f1   :  { %3389 = vrcp.f32 %v2348_v28 }
 0x3f6   :  { %v2461_v51 = vpop.xlane.xlu1 %2460 }
 0x3f7   :  { %v2571_v52 = vpop.xlane.xlu0 %2570 }
 0x3f8   :  { %3391 = vrcp.f32 %v2571_v52 }
 0x3f9   :  { %3393 = vrcp.f32 %v2461_v51 }
 0x3fc   :  { %v3386_v56 = vpop.eup %3385 }
 0x3fd   :  { %v2464_v59 = vmul.f32 %v3386_v56, %v3374_v41  ;;  %v3388_v60 = vpop.eup %3387 }
 0x3fe   :  { %v2574_v55 = vpop.xlane.xlu1 %2573  ;;  %v3390_v21 = vpop.eup %3389  ;;  %v2239_v6 = vmul.f32 %v3388_v60, %v3708_v10 }
 0x3ff   :  { %3395 = vrcp.f32 %v2574_v55  ;;  %v2466_v1 = vadd.f32 %v2464_v59, %v2353_v61  ;;  %v2352_v2 = vmul.f32 %v3390_v21, %v3372_v33 }
 0x401   :  { %v2354_v24 = vadd.f32 %v2352_v2, %v2239_v6 }
 0x405   :  { %v3392_v62 = vpop.eup %3391 }
 0x406   :  { %v3394_v63 = vpop.eup %3393  ;;  %v2577_v0 = vmul.f32 %v3392_v62, %v3378_v45 }
 0x407   :  { %v2465_v20 = vmul.f32 %v3394_v63, %v3376_v42 }
 0x408   :  { %v2579_v3 = vadd.f32 %v2577_v0, %v2466_v1 }
 0x409   :  { %v2467_v9 = vadd.f32 %v2465_v20, %v2354_v24 }
 0x40a   :  { %v2581_v7 = vmul.f32 0.25, %v2579_v3 }
 0x40c   :  { %v3396_v44 = vpop.eup %3395  ;;  %2583 = vst.msk [vmem:[#allocation10] sm:$0xff] %vm2217_vm1, %v2581_v7 }
 0x40d   :  { %v2578_v8 = vmul.f32 %v3396_v44, %v3380_v27 }
 0x40f   :  { %v2580_v12 = vadd.f32 %v2578_v8, %v2467_v9 }
 0x411   :  { %v2582_v13 = vmul.f32 0.25, %v2580_v12 }
 0x413   :  { %2584 = vst.msk [vmem:[#allocation10 + $0x8] sm:$0xff] %vm2217_vm1, %v2582_v13 }
 0x414   :  { %3488 = shalt.err (!%p3485_p10)
}
 0x415   :  { %s3514_s20 = smov 128   ;;  %s3515_s21 = smov 8  }
 0x416   :  { %2596 = dma.vmem_to_hbm [thread:$0]  %s2591_s18, 256, %s3730_s6, [#allocation4], %s3514_s20, %s3514_s20, %s3515_s21  }
 0x417   :  { %3503 = dma.done.wait [#allocation4], 256  }
 0x418   :  { %3504 = vsyncadd [#allocation4], 4294967040 }
 0x419   :  { %2600 = vsyncpa [#allocation3], 1 }
 0x41a   :  { %2601 = vsyncpa [#allocation6], 1 }
 0x41b   :  { %2602 = vsyncpa [#allocation9], 1 }
 0x41c   :  { %2603 = vsyncpa [#allocation4], 1 }

</bundles_post_ra>
